<compile_context>
chip_gen: v7x
topology: tpu7x:2x2x1
jax: 0.10.0
libtpu: 0.0.40
codegen_flags: <defaults>
</compile_context>

<pallas_src>
import functools
import math

import jax
import jax.numpy as jnp
import numpy as np
from jax.experimental import pallas as pl
from jax.experimental.pallas import tpu as pltpu


_TB_MAX = 256                      # batch-tile rows when B is large (parallel axis)
_FALLBACK_VMEM_BYTES = 64 * 2**20  # assume the most restrictive chip (v7x) if query fails


def _round_up(x, m):
    return ((x + m - 1) // m) * m


@functools.lru_cache(maxsize=1)
def _physical_vmem_bytes():
    try:
        return int(pltpu.get_tpu_info().vmem_capacity_bytes)
    except Exception:
        return _FALLBACK_VMEM_BYTES


@functools.lru_cache(maxsize=1)
def _vmem_limit_bytes():
    """Scoped-VMEM limit we request: ~96 MiB on v5e/v6e (128 MiB physical),
    ~48 MiB on v7x (64 MiB physical per TensorCore)."""
    phys = _physical_vmem_bytes()
    if phys >= 128 * 2**20:
        return 96 * 2**20
    return min(phys * 3 // 4, 48 * 2**20)


def _dae_kernel(x_ref, w1_ref, b1_ref, w2_ref, b2_ref, w3_ref, b3_ref, o_ref, acc_ref):
    """Fused forward: out = sigmoid(sigmoid(x@W1+b1)@W2+b2)@W3+b3.

    Grid = (batch tiles [parallel], h1 tiles [arbitrary reduction]). Each reduction
    step computes the sigmoid-activated h1 slice for its W1/b1 slab and accumulates
    that slice's contribution to fc2's pre-activation in a VMEM scratch. The last
    step applies the second sigmoid and the output layer and writes (tb, Cp) once.
    """
    k = pl.program_id(1)

    @pl.when(k == 0)
    def _():
        acc_ref[...] = jnp.zeros_like(acc_ref)

    # fc1 tile + sigmoid: (tb, th). x is already in the streamed weight dtype.
    pre1 = jnp.dot(x_ref[...], w1_ref[...], preferred_element_type=jnp.float32)
    h1 = jax.nn.sigmoid(pre1 + b1_ref[...])  # b1 is (1, th), broadcasts over rows

    # Accumulate this tile's contribution to fc2's pre-activation: (tb, h2), f32.
    acc_ref[...] += jnp.dot(h1.astype(w2_ref.dtype), w2_ref[...],
                            preferred_element_type=jnp.float32)

    @pl.when(k == pl.num_programs(1) - 1)
    def _():
        h2 = jax.nn.sigmoid(acc_ref[...] + b2_ref[...])
        out = jnp.dot(h2.astype(w3_ref.dtype), w3_ref[...],
                      preferred_element_type=jnp.float32) + b3_ref[...]
        o_ref[...] = out.astype(o_ref.dtype)


def _plan_hidden_tiling(D, h1, h2, w_itemsize, *, max_tile, tile_budget_bytes,
                        align=128):
    """Pick the h1 tile size: as few grid steps as possible (amortize ~0.35us/step)
    subject to the double-buffered W1/W2 tile footprint staying under the budget.
    Tiles are multiples of 128 (lane width) so W1 lane dim / W2 sublane dim align."""
    n_k = max(1, math.ceil(h1 / max_tile))
    while True:
        th = _round_up(math.ceil(h1 / n_k), align)
        if 2 * (D + h2) * th * w_itemsize <= tile_budget_bytes or th == align:
            return th
        n_k += 1


def prepare_params(w1, b1, w2, b2, w3, b3, *, weight_dtype=jnp.bfloat16,
                   max_tile=2048, tile_budget_bytes=None):
    """One-time weight preprocessing. Run OUTSIDE the per-call hot path.

    w1: [D, h1], b1: [h1], w2: [h1, h2], b2: [h2], w3: [h2, C], b3: [C].
    Pads h1 to a tile multiple and C to 128 (both exact, see header note), casts the
    streamed weights to `weight_dtype` (bf16 halves HBM traffic; f32 is bit-exact),
    and pre-tiles W1 into contiguous (n_k, D, th) slabs for contiguous per-step DMA.
    Returns (params_tuple, th, C) where th/C are static ints for dae_forward.
    """
    D, h1 = w1.shape
    h2 = w2.shape[1]
    C = w3.shape[1]
    Cp = _round_up(C, 128)
    w_item = jnp.dtype(weight_dtype).itemsize

    if tile_budget_bytes is None:
        # Budget the streamed (double-buffered) W1+W2 tiles against the requested
        # scoped-VMEM limit minus the resident buffers (x block, output, accumulator,
        # W3, biases), so the plan also holds on v7x's smaller VMEM.
        resident = (2 * _TB_MAX * D * w_item        # x block (double-buffered)
                    + 2 * _TB_MAX * Cp * 4          # output block (f32)
                    + _TB_MAX * h2 * 4              # fc2 accumulator scratch
                    + 2 * h2 * Cp * w_item          # W3 (resident, double-buffered)
                    + 2 * 4 * (h1 + h2 + Cp))       # biases
        tile_budget_bytes = max(_vmem_limit_bytes() // 2 - resident,
                                2 * (D + h2) * 128 * w_item)

    th = _plan_hidden_tiling(D, h1, h2, w_item, max_tile=max_tile,
                             tile_budget_bytes=tile_budget_bytes)
    h1p = _round_up(h1, th)
    n_k = h1p // th
    pad_h = h1p - h1
    pad_c = Cp - C

    f32 = jnp.float32
    w1p = jnp.pad(jnp.asarray(w1, f32), ((0, 0), (0, pad_h))).astype(weight_dtype)
    # Pre-tile W1 into contiguous slabs: slab k is w1p[:, k*th:(k+1)*th], stored
    # contiguously so each grid step's W1 DMA is a single contiguous HBM read.
    w1s = w1p.reshape(D, n_k, th).transpose(1, 0, 2)
    b1s = jnp.pad(jnp.asarray(b1, f32), ((0, pad_h),)).reshape(n_k, 1, th)
    w2p = jnp.pad(jnp.asarray(w2, f32), ((0, pad_h), (0, 0))).astype(weight_dtype)
    b2r = jnp.asarray(b2, f32).reshape(1, h2)
    w3c = jnp.pad(jnp.asarray(w3, f32), ((0, 0), (0, pad_c))).astype(weight_dtype)
    b3r = jnp.pad(jnp.asarray(b3, f32), ((0, pad_c),)).reshape(1, Cp)
    return (w1s, b1s, w2p, b2r, w3c, b3r), th, C


@functools.partial(jax.jit, static_argnames=("th", "num_classes"))
def dae_forward(x, w1s, b1s, w2p, b2r, w3c, b3r, *, th, num_classes):
    """x: [B, ...] (flattened to [B, D]); params as produced by prepare_params."""
    B = x.shape[0]
    n_k, D, th_ = w1s.shape
    assert th_ == th, (th_, th)
    h1p = n_k * th
    h2 = w2p.shape[1]
    Cp = w3c.shape[1]

    # Cast x once to the streamed compute dtype (no-op for the exact f32 path).
    x2 = x.reshape(B, -1).astype(w1s.dtype)
    assert x2.shape[1] == D, (x2.shape, D)

    # Batch tiling: one block for small B; otherwise tile B on a leading "parallel"
    # grid axis (megacore / v7x's two TensorCores), keeping h1 as the trailing
    # "arbitrary" reduction axis.
    if B <= _TB_MAX:
        tb, n_b, B_p = B, 1, B
    else:
        tb = _TB_MAX
        B_p = _round_up(B, tb)
        n_b = B_p // tb
        if B_p != B:
            x2 = jnp.pad(x2, ((0, B_p - B), (0, 0)))

    # Memory-bound weight-streaming kernel: tell XLA's scheduler so.
    wbytes = (n_b * (w1s.size * w1s.dtype.itemsize + w2p.size * w2p.dtype.itemsize)
              + w3c.size * w3c.dtype.itemsize)
    cost = pl.CostEstimate(
        flops=int(2 * B_p * (D * h1p + h1p * h2 + h2 * Cp)),
        transcendentals=int(B_p * (h1p + h2)),
        bytes_accessed=int(wbytes
                           + x2.size * x2.dtype.itemsize
                           + 4 * (b1s.size + b2r.size + b3r.size + B_p * Cp)),
    )

    out = pl.pallas_call(
        _dae_kernel,
        out_shape=jax.ShapeDtypeStruct((B_p, Cp), jnp.float32),
        grid_spec=pltpu.PrefetchScalarGridSpec(
            num_scalar_prefetch=0,
            grid=(n_b, n_k),
            in_specs=[
                pl.BlockSpec((tb, D), lambda b, k: (b, 0)),                 # x block
                pl.BlockSpec((pl.Squeezed(), D, th), lambda b, k: (k, 0, 0)),  # W1 slab
                pl.BlockSpec((pl.Squeezed(), 1, th), lambda b, k: (k, 0, 0)),  # b1 slab
                pl.BlockSpec((th, h2), lambda b, k: (k, 0)),                # W2 tile
                pl.BlockSpec((1, h2), lambda b, k: (0, 0)),                 # b2 (resident)
                pl.BlockSpec((h2, Cp), lambda b, k: (0, 0)),                # W3 (resident)
                pl.BlockSpec((1, Cp), lambda b, k: (0, 0)),                 # b3 (resident)
            ],
            out_specs=pl.BlockSpec((tb, Cp), lambda b, k: (b, 0)),
            scratch_shapes=[pltpu.VMEM((tb, h2), jnp.float32)],  # fc2 pre-act acc
        ),
        compiler_params=pltpu.CompilerParams(
            dimension_semantics=("parallel", "arbitrary"),
            vmem_limit_bytes=_vmem_limit_bytes(),
        ),
        cost_estimate=cost,
    )(x2, w1s, b1s, w2p, b2r, w3c, b3r)

    return out[:B, :num_classes]


def init_params(key, D, h1, h2, C):
    """Deterministic init mirroring nn.Linear's U(-1/sqrt(fan_in), 1/sqrt(fan_in))."""
    ks = jax.random.split(key, 6)

    def lin(kw, kb, fan_in, fan_out):
        bnd = 1.0 / np.sqrt(fan_in)
        w = jax.random.uniform(kw, (fan_in, fan_out), jnp.float32, -bnd, bnd)
        b = jax.random.uniform(kb, (fan_out,), jnp.float32, -bnd, bnd)
        return w, b

    w1, b1 = lin(ks[0], ks[1], D, h1)
    w2, b2 = lin(ks[2], ks[3], h1, h2)
    w3, b3 = lin(ks[4], ks[5], h2, C)
    return w1, b1, w2, b2, w3, b3


def dae_forward_ref(x, w1, b1, w2, b2, w3, b3):
    x2 = x.reshape(x.shape[0], -1).astype(jnp.float32)
    h1 = jax.nn.sigmoid(x2 @ w1 + b1)
    h2 = jax.nn.sigmoid(h1 @ w2 + b2)
    return h2 @ w3 + b3


if __name__ == "__main__":
    key = jax.random.PRNGKey(0)
    kx, kp, kx2 = jax.random.split(key, 3)

    # NCHW image flattened to D = 4*16*16 by x.view(B, -1); DAEClassifier(D, h1, h2, C).
    B, Cin, Hsp, Wsp = 2, 4, 16, 16
    D = Cin * Hsp * Wsp               # 1024
    h1, h2, C = 500, 256, 10          # h1 not a tile multiple, C < 128 (tests padding)

    x = jax.random.normal(kx, (B, Cin, Hsp, Wsp), jnp.float32)
    w1, b1, w2, b2, w3, b3 = init_params(kp, D, h1, h2, C)
    ref = np.asarray(jax.block_until_ready(dae_forward_ref(x, w1, b1, w2, b2, w3, b3)))

    # 1) Exact f32 path with a small tile so the multi-step hidden reduction runs.
    params32, th32, C32 = prepare_params(w1, b1, w2, b2, w3, b3,
                                         weight_dtype=jnp.float32, max_tile=256)
    out32 = np.asarray(jax.block_until_ready(
        dae_forward(x, *params32, th=th32, num_classes=C32)))
    assert out32.shape == (B, C), out32.shape
    err32 = np.max(np.abs(out32 - ref))
    assert np.allclose(out32, ref, rtol=3e-5, atol=3e-5), err32

    # 2) Default bf16 weight-streaming path (halved HBM traffic), single large tile.
    paramsbf, thbf, Cbf = prepare_params(w1, b1, w2, b2, w3, b3)   # weight_dtype=bf16
    outbf = np.asarray(jax.block_until_ready(
        dae_forward(x, *paramsbf, th=thbf, num_classes=Cbf)))
    assert outbf.shape == (B, C), outbf.shape
    errbf = np.max(np.abs(outbf - ref))
    assert np.allclose(outbf, ref, rtol=2e-2, atol=2e-2), errbf

    # 3) Large-batch path: exercises the leading "parallel" batch-tile grid axis.
    Bl = 512
    xl = jax.random.normal(kx2, (Bl, Cin, Hsp, Wsp), jnp.float32)
    refl = np.asarray(jax.block_until_ready(dae_forward_ref(xl, w1, b1, w2, b2, w3, b3)))
    outl = np.asarray(jax.block_until_ready(
        dae_forward(xl, *paramsbf, th=thbf, num_classes=Cbf)))
    assert outl.shape == (Bl, C), outl.shape
    errl = np.max(np.abs(outl - refl))
    assert np.allclose(outl, refl, rtol=2e-2, atol=2e-2), errl

    print("KERNEL_OK")
</pallas_src>

<mosaic_0001>
module attributes {stable_mosaic.version = 11 : i64} {
  func.func @_dae_kernel(%arg0: i32, %arg1: i32, %arg2: memref<2x1024xf32, #tpu.memory_space<vmem>>, %arg3: memref<1x1024x256xf32, #tpu.memory_space<vmem>>, %arg4: memref<1x1x256xf32, #tpu.memory_space<vmem>>, %arg5: memref<256x256xf32, #tpu.memory_space<vmem>>, %arg6: memref<1x256xf32, #tpu.memory_space<vmem>>, %arg7: memref<256x128xf32, #tpu.memory_space<vmem>>, %arg8: memref<1x128xf32, #tpu.memory_space<vmem>>, %arg9: memref<2x128xf32, #tpu.memory_space<vmem>>, %arg10: memref<2x256xf32, #tpu.memory_space<vmem>>) attributes {dimension_semantics = [#tpu.dimension_semantics<parallel>, #tpu.dimension_semantics<arbitrary>], iteration_bounds = array<i64: 1, 2>, scalar_prefetch = 0 : i64, scratch_operands = 1 : i64, tpu.core_type = #tpu.core_type<tc>, window_params = [{transform_indices = @transform_0, window_bounds = array<i64: 2, 1024>}, {transform_indices = @transform_1, window_bounds = array<i64: 1, 1024, 256>}, {transform_indices = @transform_2, window_bounds = array<i64: 1, 1, 256>}, {transform_indices = @transform_3, window_bounds = array<i64: 256, 256>}, {pipeline_mode = #tpu.pipeline_mode<synchronous>, transform_indices = @transform_4, window_bounds = array<i64: 1, 256>}, {pipeline_mode = #tpu.pipeline_mode<synchronous>, transform_indices = @transform_5, window_bounds = array<i64: 256, 128>}, {pipeline_mode = #tpu.pipeline_mode<synchronous>, transform_indices = @transform_6, window_bounds = array<i64: 1, 128>}, {transform_indices = @transform_7, window_bounds = array<i64: 2, 128>}]} {
    %c0_i32 = arith.constant 0 : i32
    %0 = arith.cmpi eq, %arg1, %c0_i32 : i32
    %1 = arith.extui %0 : i1 to i32
    %c0_i32_0 = arith.constant 0 : i32
    %2 = arith.cmpi ne, %1, %c0_i32_0 : i32
    scf.if %2 {
      %cst_17 = arith.constant 0.000000e+00 : f32
      %24 = vector.broadcast %cst_17 : f32 to vector<2x256xf32>
      %c0_18 = arith.constant 0 : index
      %c0_19 = arith.constant 0 : index
      %25 = vector.load %arg10[%c0_18, %c0_19] : memref<2x256xf32, #tpu.memory_space<vmem>>, vector<2x256xf32>
      tpu.vector_store %arg10[%c0_18, %c0_19], %24 {strides = array<i32>} : memref<2x256xf32, #tpu.memory_space<vmem>>, vector<2x256xf32>,
    } else {
    }
    %c0 = arith.constant 0 : index
    %c0_1 = arith.constant 0 : index
    %3 = vector.load %arg2[%c0, %c0_1] : memref<2x1024xf32, #tpu.memory_space<vmem>>, vector<2x1024xf32>
    %c0_2 = arith.constant 0 : index
    %c0_3 = arith.constant 0 : index
    %c0_4 = arith.constant 0 : index
    %4 = vector.load %arg3[%c0_2, %c0_3, %c0_4] : memref<1x1024x256xf32, #tpu.memory_space<vmem>>, vector<1x1024x256xf32>
    %5 = vector.shape_cast %4 : vector<1x1024x256xf32> to vector<1024x256xf32>
    %cst = arith.constant dense<0.000000e+00> : vector<2x256xf32>
    %6 = tpu.matmul %3, %5, %cst {dimension_numbers = #tpu.dot_dimension_numbers<[1], [0], [0], [1], [0, 0, 1, 1], [], []>} : vector<2x1024xf32>, vector<1024x256xf32>, vector<2x256xf32> -> vector<2x256xf32>
    %c0_5 = arith.constant 0 : index
    %c0_6 = arith.constant 0 : index
    %c0_7 = arith.constant 0 : index
    %7 = vector.load %arg4[%c0_5, %c0_6, %c0_7] : memref<1x1x256xf32, #tpu.memory_space<vmem>>, vector<1x1x256xf32>
    %8 = vector.shape_cast %7 : vector<1x1x256xf32> to vector<1x256xf32>
    %9 = vector.broadcast %8 : vector<1x256xf32> to vector<2x256xf32>
    %10 = arith.addf %6, %9 : vector<2x256xf32>
    %11 = arith.negf %10 : vector<2x256xf32>
    %12 = math.exp %11 : vector<2x256xf32>
    %cst_8 = arith.constant 1.000000e+00 : f32
    %13 = vector.broadcast %cst_8 : f32 to vector<2x256xf32>
    %14 = arith.addf %13, %12 : vector<2x256xf32>
    %15 = arith.divf %13, %14 : vector<2x256xf32>
    %c0_9 = arith.constant 0 : index
    %c0_10 = arith.constant 0 : index
    %16 = vector.load %arg10[%c0_9, %c0_10] : memref<2x256xf32, #tpu.memory_space<vmem>>, vector<2x256xf32>
    %c0_11 = arith.constant 0 : index
    %c0_12 = arith.constant 0 : index
    %17 = vector.load %arg5[%c0_11, %c0_12] : memref<256x256xf32, #tpu.memory_space<vmem>>, vector<256x256xf32>
    %cst_13 = arith.constant dense<0.000000e+00> : vector<2x256xf32>
    %18 = tpu.matmul %15, %17, %cst_13 {dimension_numbers = #tpu.dot_dimension_numbers<[1], [0], [0], [1], [0, 0, 1, 1], [], []>} : vector<2x256xf32>, vector<256x256xf32>, vector<2x256xf32> -> vector<2x256xf32>
    %19 = arith.addf %16, %18 : vector<2x256xf32>
    %c0_14 = arith.constant 0 : index
    %c0_15 = arith.constant 0 : index
    %20 = vector.load %arg10[%c0_14, %c0_15] : memref<2x256xf32, #tpu.memory_space<vmem>>, vector<2x256xf32>
    tpu.vector_store %arg10[%c0_14, %c0_15], %19 {strides = array<i32>} : memref<2x256xf32, #tpu.memory_space<vmem>>, vector<2x256xf32>,
    %c1_i32 = arith.constant 1 : i32
    %21 = arith.cmpi eq, %arg1, %c1_i32 : i32
    %22 = arith.extui %21 : i1 to i32
    %c0_i32_16 = arith.constant 0 : i32
    %23 = arith.cmpi ne, %22, %c0_i32_16 : i32
    scf.if %23 {
      %c0_17 = arith.constant 0 : index
      %c0_18 = arith.constant 0 : index
      %24 = vector.load %arg10[%c0_17, %c0_18] : memref<2x256xf32, #tpu.memory_space<vmem>>, vector<2x256xf32>
      %c0_19 = arith.constant 0 : index
      %c0_20 = arith.constant 0 : index
      %25 = vector.load %arg6[%c0_19, %c0_20] : memref<1x256xf32, #tpu.memory_space<vmem>>, vector<1x256xf32>
      %26 = vector.broadcast %25 : vector<1x256xf32> to vector<2x256xf32>
      %27 = arith.addf %24, %26 : vector<2x256xf32>
      %28 = arith.negf %27 : vector<2x256xf32>
      %29 = math.exp %28 : vector<2x256xf32>
      %cst_21 = arith.constant 1.000000e+00 : f32
      %30 = vector.broadcast %cst_21 : f32 to vector<2x256xf32>
      %31 = arith.addf %30, %29 : vector<2x256xf32>
      %32 = arith.divf %30, %31 : vector<2x256xf32>
      %c0_22 = arith.constant 0 : index
      %c0_23 = arith.constant 0 : index
      %33 = vector.load %arg7[%c0_22, %c0_23] : memref<256x128xf32, #tpu.memory_space<vmem>>, vector<256x128xf32>
      %cst_24 = arith.constant dense<0.000000e+00> : vector<2x128xf32>
      %34 = tpu.matmul %32, %33, %cst_24 {dimension_numbers = #tpu.dot_dimension_numbers<[1], [0], [0], [1], [0, 0, 1, 1], [], []>} : vector<2x256xf32>, vector<256x128xf32>, vector<2x128xf32> -> vector<2x128xf32>
      %c0_25 = arith.constant 0 : index
      %c0_26 = arith.constant 0 : index
      %35 = vector.load %arg8[%c0_25, %c0_26] : memref<1x128xf32, #tpu.memory_space<vmem>>, vector<1x128xf32>
      %36 = vector.broadcast %35 : vector<1x128xf32> to vector<2x128xf32>
      %37 = arith.addf %34, %36 : vector<2x128xf32>
      %c0_27 = arith.constant 0 : index
      %c0_28 = arith.constant 0 : index
      %38 = vector.load %arg9[%c0_27, %c0_28] : memref<2x128xf32, #tpu.memory_space<vmem>>, vector<2x128xf32>
      tpu.vector_store %arg9[%c0_27, %c0_28], %37 {strides = array<i32>} : memref<2x128xf32, #tpu.memory_space<vmem>>, vector<2x128xf32>,
    } else {
    }
    return
  }
  func.func @transform_0(%arg0: i32, %arg1: i32) -> (i32, i32) {
    %c0_i32 = arith.constant 0 : i32
    %c0_i32_0 = arith.constant 0 : i32
    return %arg0, %c0_i32 : i32, i32
  }
  func.func @transform_1(%arg0: i32, %arg1: i32) -> (i32, i32, i32) {
    %c0_i32 = arith.constant 0 : i32
    %c0_i32_0 = arith.constant 0 : i32
    %c0_i32_1 = arith.constant 0 : i32
    return %arg1, %c0_i32, %c0_i32_0 : i32, i32, i32
  }
  func.func @transform_2(%arg0: i32, %arg1: i32) -> (i32, i32, i32) {
    %c0_i32 = arith.constant 0 : i32
    %c0_i32_0 = arith.constant 0 : i32
    %c0_i32_1 = arith.constant 0 : i32
    return %arg1, %c0_i32, %c0_i32_0 : i32, i32, i32
  }
  func.func @transform_3(%arg0: i32, %arg1: i32) -> (i32, i32) {
    %c0_i32 = arith.constant 0 : i32
    %c0_i32_0 = arith.constant 0 : i32
    return %arg1, %c0_i32 : i32, i32
  }
  func.func @transform_4(%arg0: i32, %arg1: i32) -> (i32, i32) {
    %c0_i32 = arith.constant 0 : i32
    %c0_i32_0 = arith.constant 0 : i32
    %c0_i32_1 = arith.constant 0 : i32
    return %c0_i32, %c0_i32_0 : i32, i32
  }
  func.func @transform_5(%arg0: i32, %arg1: i32) -> (i32, i32) {
    %c0_i32 = arith.constant 0 : i32
    %c0_i32_0 = arith.constant 0 : i32
    %c0_i32_1 = arith.constant 0 : i32
    return %c0_i32, %c0_i32_0 : i32, i32
  }
  func.func @transform_6(%arg0: i32, %arg1: i32) -> (i32, i32) {
    %c0_i32 = arith.constant 0 : i32
    %c0_i32_0 = arith.constant 0 : i32
    %c0_i32_1 = arith.constant 0 : i32
    return %c0_i32, %c0_i32_0 : i32, i32
  }
  func.func @transform_7(%arg0: i32, %arg1: i32) -> (i32, i32) {
    %c0_i32 = arith.constant 0 : i32
    %c0_i32_0 = arith.constant 0 : i32
    return %arg0, %c0_i32 : i32, i32
  }
}

</mosaic_0001>

<bundles_post_ra>
// kernel: dae_forward.1
= control target key start
LH: loop header
LB: loop body
LE: loop exit
PB: predicated region body
PF: predicated region fallthrough
CT: control target
= control target key end

     0   :  { %s3090_s0 = inlined_call_operand.vmem [shape: f32[2,1024], index: 0, kind: input, shape index: {}]   ;;  %s3091_s1 = inlined_call_operand.hbm [shape: f32[2,1024,256], index: 1, kind: input, shape index: {}]   ;;  %s3092_s2 = inlined_call_operand.hbm [shape: f32[2,1,256], index: 2, kind: input, shape index: {}]   ;;  %s3093_s3 = inlined_call_operand.hbm [shape: f32[512,256], index: 3, kind: input, shape index: {}]   ;;  %s3094_s4 = inlined_call_operand.hbm [shape: f32[1,256], index: 4, kind: input, shape index: {}]   ;;  %s3095_s5 = inlined_call_operand.hbm [shape: f32[256,128], index: 5, kind: input, shape index: {}]   ;;  %s3096_s6 = inlined_call_operand.hbm [shape: f32[1,128], index: 6, kind: input, shape index: {}]   ;;  %s3097_s7 = inlined_call_operand.hbm [shape: f32[2,128], index: 7, kind: output, shape index: {}]  }
   0x1   :  { %3114 = sst [smem:[#allocation24_spill]] %s3090_s0 }
   0x2   :  { %3115 = sst [smem:[#allocation25_spill]] %s3092_s2 }
   0x3   :  { %3116 = sst [smem:[#allocation26_spill]] %s3094_s4 }
   0x4   :  { %3117 = sst [smem:[#allocation27_spill]] %s3097_s7 }
   0x5   :  { %12 = vsyncpa [#allocation4], 0 }
   0x6   :  { %14 = vsyncpa [#allocation4 + $0x1], 0 }
   0x7   :  { %15 = vsyncpa [#allocation7], 0 }
   0x8   :  { %17 = vsyncpa [#allocation7 + $0x1], 0 }
   0x9   :  { %18 = vsyncpa [#allocation10], 0 }
   0xa   :  { %19 = vsyncpa [#allocation13], 0 }
   0xb   :  { %20 = vsyncpa [#allocation5], 0  ;;  %s2389_s24 = smov 0   ;;  %s2391_s25 = smov 0  }
   0xc   :  { %s2393_s26 = smov 0   ;;  %s2395_s27 = smov 0  }
   0xd   :  { %s2397_s28 = smov 0   ;;  %s2399_s29 = smov 0  }
   0xe LB: > { %3118 = sst [smem:[#allocation20_spill]] %s2322_s26  ;;  %s2418_s30 = sadd.s32 4294967295, %s2334_s29   ;;  %s2334_s29 = sphi %s2399_s29, %s26_s29   ;;  %s2330_s28 = sphi %s2397_s28, %s3152_s28   ;;  %s2326_s27 = sphi %s2395_s27, %s3151_s27   ;;  %s2322_s26 = sphi %s2393_s26, %s3147_s26   ;;  %s2318_s25 = sphi %s2391_s25, %s3150_s25   ;;  %s2314_s24 = sphi %s2389_s24, %s3149_s24  }
   0xf   : > { %3119 = sst [smem:[#allocation21_spill]] %s2334_s29  ;;  %p84_p0 = scmp.ne.s32.totalorder %s2318_s25, %s2314_s24 }
  0x10   : > { %p3098_p1 = scmp.eq.s32.totalorder %s2418_s30, 0  ;;  %p1513_p2 = scmp.ge.s32.totalorder %s2334_s29, 1 }
  0x11   : > { %p236_p3 = scmp.lt.s32.totalorder %s2334_s29, 3  ;;  %s2336_s10 = smov [#allocation9]  }
  0x12   : > { %p2426_p4 = por %p3098_p1, %p84_p0  ;;  %s257_s11 = sshll.u32 %s2336_s10, 4  ;;  %s258_s11 = int_to_ptr.vmem [resolvable:$true] %s257_s11 }
  0x13   : > { %p2430_p5 = pnand %p1513_p2, %p236_p3  ;;  %s35_s13 = sadd.s32 1, %s2330_s28 }
  0x14   : > { %s3120_s8 = scalar_select %p2426_p4, 1, 0 }
  0x15   : > { %s3121_s9 = scalar_select %p2430_p5, 1, 0 }
  0x16   : > { %p1967_p6 = pneg %p2430_p5  ;;  %s71_s14 = sadd.s32 1, %s2322_s26 }
  0x17   : > { %p2444_p8 = scmp.ge.s32.totalorder %s35_s13, 2  ;;  %s3124_s4 = sld [smem:[#allocation26_spill]] }
  0x18   : > { %p2438_p7 = pnand %p1967_p6, %p3098_p1 }
  0x19   : > { %s3123_s15 = scalar_select %p2444_p8, 1, 0 }
  0x1a   : > { %s3122_s12 = scalar_select %p2438_p7, 1, 0 }
  0x1b   : > { %p2456_p10 = pneg %p2438_p7 }
  0x1d   : > { %s2068_s18 = scalar_lea.hbm %s3124_s4, 32 }
  0x1e   : > { %p2069_p9 = scmp.ne.s32.totalorder %s3124_s4, %s2068_s18  ;;  %p2075_p13 = scmp.lt.u32.totalorder %s2068_s18, %s3124_s4 }
  0x1f   : > { %s3125_s21 = scalar_select %p2456_p10, 1, 0 }
  0x20   : > { %p2071_p11 = pnand %p2456_p10, %p2069_p9 }
  0x22   : > { %p2072_p12 = pneg %p2071_p11 }
  0x24   : > { %p2077_p0 = pnand %p2075_p13, %p2072_p12 }
  0x26   : > { %2080 = shalt.err (!%p2077_p0)
}
  0x27   : > { %s2081_s24 = scalar_lea.vmem %s258_s11, 32  ;;  %p2089_p1 = scmp.lt.s32.totalorder %s258_s11, %s258_s11 }
  0x28   : > { %p2082_p2 = scmp.ne.s32.totalorder %s258_s11, %s2081_s24  ;;  %p2090_p4 = scmp.lt.s32.totalorder %s2081_s24, %s2081_s24 }
  0x2a   : > { %p2084_p3 = pnand %p2082_p2, %p2456_p10  ;;  %p2091_p5 = por %p2090_p4, %p2089_p1 }
  0x2c   : > { %p2085_p6 = pneg %p2084_p3 }
  0x2e   : > { %p2092_p8 = pnand %p2091_p5, %p2085_p6 }
  0x30   : > { %2095 = shalt.err (!%p2092_p8)
}
  0x31   : > { %1970 = dma.hbm_to_vmem [thread:$0]  (!%p2438_p7), %s3124_s4, 32, %s258_s11, [#allocation10]  }
  0x32   : > { %p3126_p1 = scmp.ne.s32.totalorder %s3123_s15, 0  ;;  %p78_p4 = scmp.ne.s32.totalorder %s2322_s26, %s2318_s25 }
  0x33   : > { %p79_p5 = scmp.eq.s32.totalorder %s2334_s29, 0  ;;  %p1990_p8 = scmp.lt.s32.totalorder %s2334_s29, 2 }
  0x34   : > { %s3154_s13 = smov (%p3126_p1, %s35_s13), 0  ;;  %s2483_s18 = sand.u32 1, %s2322_s26  }
  0x35   : > { %3127 = sst [smem:[#allocation22_spill]] %s3154_s13  ;;  %s68_s17 = ssub.s32 %s2330_s28, %s3154_s13 }
  0x36   : > { %p69_p9 = scmp.eq.s32.totalorder %s68_s17, 0  ;;  %p80_p11 = por %p79_p5, %p78_p4 }
  0x37   : > { %s313_s19 = sand.u32 1, %s2334_s29   ;;  %s1522_s15 = sshll.u32 %s2483_s18, 1 }
  0x38   : > { %s2489_s20 = scalar_select %p69_p9, %s2322_s26, %s71_s14  }
  0x39   : > { %p2491_p12 = pnand %p1990_p8, %p80_p11  ;;  %s1547_s22 = sshll.u32 %s2330_s28, 5 }
  0x3a   : > { %3128 = sst [smem:[#allocation23_spill]] %s2489_s20  ;;  %s3130_s2 = sld [smem:[#allocation25_spill]] }
  0x3b   : > { %s3129_s11 = scalar_select %p2491_p12, 1, 0 }
  0x3c   : > { %s317_s16 = scalar_lea.vmem [#allocation6], %s1522_s15  ;;  %s2505_s4 = scalar_lea.sflag [#allocation7], %s313_s19 }
  0x3d   : > { %s325_s17 = sshll.u32 %s317_s16, 4  ;;  %p2511_p0 = pneg %p2491_p12  ;;  %s2502_s17 = int_to_ptr.vmem [resolvable:$true] %s325_s17 }
  0x3f   : > { %s3131_s20 = scalar_select %p2511_p0, 1, 0 }
  0x40   : > { %s2500_s10 = scalar_lea.hbm %s3130_s2, %s1547_s22  ;;  %s2101_s15 = scalar_lea.hbm %s3130_s2, 64 }
  0x41   : > { %s2096_s13 = scalar_lea.hbm %s2500_s10, 32  ;;  %p2102_p6 = scmp.lt.u32.totalorder %s2500_s10, %s3130_s2 }
  0x42   : > { %p2097_p13 = scmp.ne.s32.totalorder %s2500_s10, %s2096_s13  ;;  %p2103_p1 = scmp.lt.u32.totalorder %s2101_s15, %s2096_s13 }
  0x43   : > { %p2105_p5 = scmp.lt.u32.totalorder %s2096_s13, %s2500_s10 }
  0x44   : > { %p2099_p2 = pnand %p2511_p0, %p2097_p13  ;;  %p2104_p4 = por %p2103_p1, %p2102_p6 }
  0x46   : > { %p2100_p3 = pneg %p2099_p2  ;;  %p2106_p8 = por %p2105_p5, %p2104_p4 }
  0x48   : > { %p2107_p9 = pnand %p2106_p8, %p2100_p3 }
  0x4a   : > { %2110 = shalt.err (!%p2107_p9)
}
  0x4b   : > { %s2111_s19 = scalar_lea.vmem %s2502_s17, 32  ;;  %s2337_s22 = smov [#allocation6]  }
  0x4c   : > { %p2112_p11 = scmp.ne.s32.totalorder %s2502_s17, %s2111_s19  ;;  %s2116_s23 = sshll.u32 %s2337_s22, 4  ;;  %s2117_s23 = int_to_ptr.vmem [resolvable:$false] %s2116_s23 }
  0x4d   : > { %s2118_s24 = scalar_lea.vmem %s2117_s23, 64  ;;  %p2119_p7 = scmp.lt.s32.totalorder %s2502_s17, %s2117_s23 }
  0x4e   : > { %p2114_p13 = pnand %p2112_p11, %p2511_p0  ;;  %p2120_p10 = scmp.lt.s32.totalorder %s2118_s24, %s2111_s19 }
  0x50   : > { %p2115_p2 = pneg %p2114_p13  ;;  %p2121_p6 = por %p2120_p10, %p2119_p7 }
  0x52   : > { %p2122_p1 = pnand %p2121_p6, %p2115_p2 }
  0x54   : > { %2125 = shalt.err (!%p2122_p1)
}
  0x55   : > { %1983 = dma.hbm_to_vmem [thread:$0]  (!%p2491_p12), %s2500_s10, 32, %s2502_s17, %s2505_s4  }
  0x56   : > { %s2338_s13 = smov [#allocation11]   ;;  %s2126_s22 = scalar_lea.hbm %s3095_s5, 4096 }
  0x57   : > { %s267_s15 = sshll.u32 %s2338_s13, 4  ;;  %p2127_p7 = scmp.ne.s32.totalorder %s3095_s5, %s2126_s22  ;;  %s268_s15 = int_to_ptr.vmem [resolvable:$true] %s267_s15 }
  0x58   : > { %p3132_p10 = scmp.ne.s32.totalorder %s3125_s21, 0  ;;  %p2133_p5 = scmp.lt.u32.totalorder %s2126_s22, %s3095_s5 }
  0x5a   : > { %p2129_p3 = pnand %p2127_p7, %p3132_p10 }
  0x5c   : > { %p2130_p4 = pneg %p2129_p3 }
  0x5e   : > { %p2135_p8 = pnand %p2133_p5, %p2130_p4 }
  0x60   : > { %2138 = shalt.err (!%p2135_p8)
}
  0x61   : > { %s2139_s10 = scalar_lea.vmem %s268_s15, 4096  ;;  %p2147_p2 = scmp.lt.s32.totalorder %s268_s15, %s268_s15 }
  0x62   : > { %p2140_p9 = scmp.ne.s32.totalorder %s268_s15, %s2139_s10  ;;  %p2148_p6 = scmp.lt.s32.totalorder %s2139_s10, %s2139_s10 }
  0x64   : > { %p2142_p11 = pnand %p2140_p9, %p3132_p10  ;;  %p2149_p1 = por %p2148_p6, %p2147_p2 }
  0x66   : > { %p2143_p13 = pneg %p2142_p11 }
  0x68   : > { %p2150_p12 = pnand %p2149_p1, %p2143_p13 }
  0x6a   : > { %2153 = shalt.err (!%p2150_p12)
}
  0x6b   : > { %s2339_s2 = smov 128   ;;  %s2340_s17 = smov 8  }
  0x6c   : > { %p3133_p7 = scmp.ne.s32.totalorder %s3122_s12, 0  ;;  %s2341_s16 = smov [#allocation12]  }
  0x6d   : > { %s281_s22 = sshll.u32 %s2341_s16, 4  ;;  %s1519_s23 = sshll.u32 %s2483_s18, 11  ;;  %s282_s22 = int_to_ptr.vmem [resolvable:$true] %s281_s22 }
  0x6e   : > { %1973 = dma.hbm_to_vmem [thread:$0]  (!%p3133_p7), %s3095_s5, 4096, %s268_s15, [#allocation10], %s2339_s2, %s2339_s2, %s2340_s17  }
  0x6f   : > { %s2154_s10 = scalar_lea.hbm %s3096_s6, 16 }
  0x70   : > { %p2155_p12 = scmp.ne.s32.totalorder %s3096_s6, %s2154_s10  ;;  %p2161_p5 = scmp.lt.u32.totalorder %s2154_s10, %s3096_s6 }
  0x72   : > { %p2157_p3 = pnand %p2155_p12, %p3132_p10 }
  0x74   : > { %p2158_p4 = pneg %p2157_p3 }
  0x76   : > { %p2163_p8 = pnand %p2161_p5, %p2158_p4 }
  0x78   : > { %2166 = shalt.err (!%p2163_p8)
}
  0x79   : > { %s2167_s15 = scalar_lea.vmem %s282_s22, 16  ;;  %s2174_s2 = scalar_lea.vmem %s282_s22, 32 }
  0x7a   : > { %p2168_p9 = scmp.ne.s32.totalorder %s282_s22, %s2167_s15  ;;  %p2175_p2 = scmp.lt.s32.totalorder %s282_s22, %s282_s22 }
  0x7b   : > { %p2176_p6 = scmp.lt.s32.totalorder %s2174_s2, %s2167_s15 }
  0x7c   : > { %p2170_p11 = pnand %p2168_p9, %p3132_p10 }
  0x7d   : > { %p2177_p1 = por %p2176_p6, %p2175_p2 }
  0x7e   : > { %p2171_p13 = pneg %p2170_p11 }
  0x80   : > { %p2178_p0 = pnand %p2177_p1, %p2171_p13 }
  0x82   : > { %2181 = shalt.err (!%p2178_p0)
}
  0x83   : > { %1976 = dma.hbm_to_vmem [thread:$0]  (!%p3133_p7), %s3096_s6, 16, %s282_s22, [#allocation13]  }
  0x84   : > { %s1546_s0 = sshll.u32 %s2330_s28, 15  ;;  %s296_s14 = scalar_lea.vmem [#allocation3], %s1519_s23 }
  0x85   : > { %s2576_s17 = scalar_lea.hbm %s3091_s1, %s1546_s0  ;;  %s303_s13 = sshll.u32 %s296_s14, 4  ;;  %s2578_s13 = int_to_ptr.vmem [resolvable:$true] %s303_s13 }
  0x86   : > { %s293_s12 = scalar_lea.sflag [#allocation4], %s2483_s18  ;;  %s2182_s16 = scalar_lea.hbm %s2576_s17, 32768 }
  0x87   : > { %p2183_p0 = scmp.ne.s32.totalorder %s2576_s17, %s2182_s16  ;;  %p3134_p10 = scmp.ne.s32.totalorder %s3131_s20, 0 }
  0x88   : > { %s2187_s24 = scalar_lea.hbm %s3091_s1, 65536  ;;  %p2188_p3 = scmp.lt.u32.totalorder %s2576_s17, %s3091_s1 }
  0x89   : > { %p2185_p12 = pnand %p2183_p0, %p3134_p10  ;;  %p2189_p4 = scmp.lt.u32.totalorder %s2187_s24, %s2182_s16 }
  0x8a   : > { %p2191_p8 = scmp.lt.u32.totalorder %s2182_s16, %s2576_s17 }
  0x8b   : > { %p2186_p7 = pneg %p2185_p12  ;;  %p2190_p5 = por %p2189_p4, %p2188_p3 }
  0x8d   : > { %p2192_p9 = por %p2191_p8, %p2190_p5 }
  0x8f   : > { %p2193_p11 = pnand %p2192_p9, %p2186_p7 }
  0x91   : > { %2196 = shalt.err (!%p2193_p11)
}
  0x92   : > { %s2197_s23 = scalar_lea.vmem %s2578_s13, 32768  ;;  %s2342_s2 = smov [#allocation3]  }
  0x93   : > { %p2198_p13 = scmp.ne.s32.totalorder %s2578_s13, %s2197_s23  ;;  %s2202_s26 = sshll.u32 %s2342_s2, 4  ;;  %s2203_s26 = int_to_ptr.vmem [resolvable:$false] %s2202_s26 }
  0x94   : > { %s2204_s29 = scalar_lea.vmem %s2203_s26, 65536  ;;  %p2205_p1 = scmp.lt.s32.totalorder %s2578_s13, %s2203_s26 }
  0x95   : > { %p2200_p2 = pnand %p2198_p13, %p3134_p10  ;;  %p2206_p0 = scmp.lt.s32.totalorder %s2204_s29, %s2197_s23 }
  0x97   : > { %p2201_p6 = pneg %p2200_p2  ;;  %p2207_p12 = por %p2206_p0, %p2205_p1 }
  0x99   : > { %p2208_p3 = pnand %p2207_p12, %p2201_p6 }
  0x9b   : > { %2211 = shalt.err (!%p2208_p3)
}
  0x9c   : > { %s2343_s0 = smov 256   ;;  %s2344_s7 = smov 16  }
  0x9d   : > { %p3135_p7 = scmp.ne.s32.totalorder %s3129_s11, 0  ;;  %s1549_s21 = sshll.u32 %s2330_s28, 13 }
  0x9e   : > { %s3136_s14 = sshll.u32 %s2483_s18, 9  ;;  %s2613_s10 = scalar_lea.hbm %s3093_s3, %s1549_s21 }
  0x9f   : > { %1980 = dma.hbm_to_vmem [thread:$0]  (!%p3135_p7), %s2576_s17, 32768, %s2578_s13, %s293_s12, %s2343_s0, %s2343_s0, %s2344_s7  }
  0xa0   : > { %s336_s16 = scalar_lea.vmem [#allocation8], %s3136_s14  ;;  %s2212_s15 = scalar_lea.hbm %s2613_s10, 8192 }
  0xa1   : > { %s344_s22 = sshll.u32 %s336_s16, 4  ;;  %p2213_p4 = scmp.ne.s32.totalorder %s2613_s10, %s2212_s15  ;;  %s2615_s22 = int_to_ptr.vmem [resolvable:$true] %s344_s22 }
  0xa2   : > { %s2217_s13 = scalar_lea.hbm %s3093_s3, 16384  ;;  %p2218_p9 = scmp.lt.u32.totalorder %s2613_s10, %s3093_s3 }
  0xa3   : > { %p2215_p5 = pnand %p2213_p4, %p3134_p10  ;;  %p2219_p11 = scmp.lt.u32.totalorder %s2217_s13, %s2212_s15 }
  0xa4   : > { %p2221_p2 = scmp.lt.u32.totalorder %s2212_s15, %s2613_s10 }
  0xa5   : > { %p2216_p8 = pneg %p2215_p5  ;;  %p2220_p13 = por %p2219_p11, %p2218_p9 }
  0xa7   : > { %p2222_p6 = por %p2221_p2, %p2220_p13 }
  0xa9   : > { %p2223_p1 = pnand %p2222_p6, %p2216_p8 }
  0xab   : > { %2226 = shalt.err (!%p2223_p1)
}
  0xac   : > { %s2227_s2 = scalar_lea.vmem %s2615_s22, 8192  ;;  %s2345_s26 = smov [#allocation8]  }
  0xad   : > { %p2228_p0 = scmp.ne.s32.totalorder %s2615_s22, %s2227_s2  ;;  %s2232_s29 = sshll.u32 %s2345_s26, 4  ;;  %s2233_s29 = int_to_ptr.vmem [resolvable:$false] %s2232_s29 }
  0xae   : > { %s2234_s21 = scalar_lea.vmem %s2233_s29, 16384  ;;  %p2235_p4 = scmp.lt.s32.totalorder %s2615_s22, %s2233_s29 }
  0xaf   : > { %p2230_p12 = pnand %p2228_p0, %p3134_p10  ;;  %p2236_p5 = scmp.lt.s32.totalorder %s2234_s21, %s2227_s2 }
  0xb1   : > { %p2231_p3 = pneg %p2230_p12  ;;  %p2237_p9 = por %p2236_p5, %p2235_p4 }
  0xb3   : > { %p2238_p11 = pnand %p2237_p9, %p2231_p3 }
  0xb5   : > { %2241 = shalt.err (!%p2238_p11)
}
  0xb6   : > { %1986 = dma.hbm_to_vmem [thread:$0]  (!%p3135_p7), %s2613_s10, 8192, %s2615_s22, %s2505_s4, %s2343_s0, %s2343_s0, %s2344_s7  }
  0xb7   : > { %p3137_p10 = scmp.ne.s32.totalorder %s3121_s9, 0 }
  0xb8   : > { %s358_s20 = sand.u32 (!%p3137_p10), 1, %s2318_s25   ;;  %p3138_p8 = scmp.ne.s32.totalorder (!%p3137_p10), %s3120_s8, 0 }
  0xb9   : > { %356 = sbr.rel (%p3137_p10) target bundleno = 1157 (0x485), region = 48  ;;  %s1530_s14 = sshll.u32 (!%p3137_p10), %s358_s20, 11 }
  0xba   : > { %s359_s16 = scalar_lea.sflag (!%p3137_p10), [#allocation4], %s358_s20  ;;  %s2645_s19 = scalar_lea.vmem (!%p3137_p10), [#allocation3], %s1530_s14 }
  0xc0   : > { %2293 = dma.done.wait (%p3138_p8), %s359_s16, 32768  }
  0xc1   : > { %2295 = vsyncadd (%p3138_p8), %s359_s16, 4294934528  ;;  %s367_s11 = sand.u32 1, %s2418_s30   ;;  %s1531_s24 = sshll.u32 %s358_s20, 1 }
  0xc2   : > { %s368_s4 = scalar_lea.sflag [#allocation7], %s367_s11  ;;  %s2652_s0 = scalar_lea.vmem [#allocation6], %s1531_s24 }
  0xc3   : > { %2297 = dma.done.wait (%p3138_p8), %s368_s4, 8224  }
  0xc4   : > { %2299 = vsyncadd (%p3138_p8), %s368_s4, 4294959072  ;;  %s1532_s9 = sshll.u32 %s358_s20, 9  ;;  %p3139_p7 = scmp.eq.s32.totalorder %s2418_s30, 0 }
  0xc5   : > { %s2658_s7 = scalar_lea.vmem [#allocation8], %s1532_s9 }
  0xc6   : > { %2301 = dma.done.wait (%p3139_p7), [#allocation10], 4128   ;;  %p3140_p13 = pmov %p3139_p7 }
  0xc7   : > { %p3141_p2 = pmov %p3139_p7 }
  0xc8   : > { %2303 = vsyncadd (%p3140_p13), [#allocation10], 4294963168 }
  0xc9   : > { %2305 = dma.done.wait (%p3141_p2), [#allocation13], 16   ;;  %p3142_p6 = pmov %p3141_p2 }
  0xca   : > { %p1536_p1 = scmp.ne.s32.totalorder %s2326_s27, 0 }
  0xcb   : > { %2307 = vsyncadd (%p3142_p6), [#allocation13], 4294967280  ;;  %v2346_v0 = vmov (!%p1536_p1), 0.0  }
  0xcc   : > { %442 = sbr.rel (%p1536_p1) target bundleno = 211 (0xd3), region = 76  ;;  %443 = vst [vmem:[#allocation2] sm:$0xf] (!%p1536_p1), %v2346_v0 }
  0xd3 PF: > { %v511_v1 = vld [vmem:[%s2645_s19 + $0x208] sm:$0xff]  ;;  %v513_v2 = vld [vmem:[%s2645_s19 + $0x218] sm:$0xff]  ;;  %v510_v3 = vld [vmem:[%s2645_s19 + $0x200] sm:$0xff]  ;;  %v704_v27 = vlaneseq  ;;  %v2347_v28 = vmov 1983009808   ;;  %s3143_s10 = sld [smem:[#allocation24_spill]] }
  0xd4   : > { %v1649_v4 = vpack.c.bf16 %v513_v2, %v511_v1  ;;  %v512_v5 = vld [vmem:[%s2645_s19 + $0x210] sm:$0xff]  ;;  %v515_v6 = vld [vmem:[%s2645_s19 + $0x228] sm:$0xff]  ;;  %v517_v7 = vld [vmem:[%s2645_s19 + $0x238] sm:$0xff]  ;;  %v718_v29 = vunpack.c.l.s4 %v2347_v28  ;;  %p1539_p0 = scmp.ne.s32.totalorder %s2326_s27, 1 }
  0xd5   : > { %v1651_v8 = vpack.c.bf16 %v512_v5, %v510_v3  ;;  %v1653_v9 = vpack.c.bf16 %v517_v7, %v515_v6  ;;  %v514_v10 = vld [vmem:[%s2645_s19 + $0x220] sm:$0xff]  ;;  %v516_v11 = vld [vmem:[%s2645_s19 + $0x230] sm:$0xff]  ;;  %v519_v12 = vld [vmem:[%s2645_s19 + $0x248] sm:$0xff]  ;;  %v2691_v36 = vshrl.u32 %v704_v27, 7 }
  0xd6   : > { %1650 = vmatprep.subr.bf16.mxu0 %v1649_v4  ;;  %v521_v13 = vld [vmem:[%s2645_s19 + $0x258] sm:$0xff]  ;;  %v1655_v14 = vpack.c.bf16 %v516_v11, %v514_v10  ;;  %v518_v16 = vld [vmem:[%s2645_s19 + $0x240] sm:$0xff]  ;;  %v520_v17 = vld [vmem:[%s2645_s19 + $0x250] sm:$0xff]  ;;  %v719_v37 = vunpack.c.0.s8 %v718_v29 }
  0xd7   : > { %1652 = vmatpush1.bf16.msra.mxu0 %v1651_v8  ;;  %v1657_v15 = vpack.c.bf16 %v521_v13, %v519_v12  ;;  %v523_v18 = vld [vmem:[%s2645_s19 + $0x268] sm:$0xff]  ;;  %v525_v19 = vld [vmem:[%s2645_s19 + $0x278] sm:$0xff]  ;;  %v1659_v20 = vpack.c.bf16 %v520_v17, %v518_v16  ;;  %v522_v22 = vld [vmem:[%s2645_s19 + $0x260] sm:$0xff] }
  0xd8   : > { %1654 = vmatprep.subr.bf16.mxu0 %v1653_v9  ;;  %v1661_v21 = vpack.c.bf16 %v525_v19, %v523_v18  ;;  %v524_v23 = vld [vmem:[%s2645_s19 + $0x270] sm:$0xff]  ;;  %v527_v24 = vld [vmem:[%s2645_s19 + $0x288] sm:$0xff]  ;;  %v529_v25 = vld [vmem:[%s2645_s19 + $0x298] sm:$0xff]  ;;  %v2698_v44 = vsub.s32 %v719_v37, %v2691_v36 }
  0xd9   : > { %v1663_v26 = vpack.c.bf16 %v524_v23, %v522_v22  ;;  %v1665_v30 = vpack.c.bf16 %v529_v25, %v527_v24  ;;  %v526_v31 = vld [vmem:[%s2645_s19 + $0x280] sm:$0xff]  ;;  %v528_v32 = vld [vmem:[%s2645_s19 + $0x290] sm:$0xff]  ;;  %v531_v33 = vld [vmem:[%s2645_s19 + $0x2a8] sm:$0xff] }
  0xda   : > { %v533_v34 = vld [vmem:[%s2645_s19 + $0x2b8] sm:$0xff]  ;;  %v1667_v35 = vpack.c.bf16 %v528_v32, %v526_v31  ;;  %v530_v39 = vld [vmem:[%s2645_s19 + $0x2a0] sm:$0xff]  ;;  %v532_v40 = vld [vmem:[%s2645_s19 + $0x2b0] sm:$0xff] }
  0xdb   : > { %1656 = vmatpush1.bf16.msra.mxu0 %v1655_v14  ;;  %v1669_v38 = vpack.c.bf16 %v533_v34, %v531_v33  ;;  %v535_v41 = vld [vmem:[%s2645_s19 + $0x2c8] sm:$0xff]  ;;  %v537_v42 = vld [vmem:[%s2645_s19 + $0x2d8] sm:$0xff]  ;;  %v1671_v43 = vpack.c.bf16 %v532_v40, %v530_v39  ;;  %v534_v46 = vld [vmem:[%s2645_s19 + $0x2c0] sm:$0xff] }
  0xdc   : > { %1658 = vmatprep.subr.bf16.mxu0 %v1657_v15  ;;  %v1673_v45 = vpack.c.bf16 %v537_v42, %v535_v41  ;;  %v536_v47 = vld [vmem:[%s2645_s19 + $0x2d0] sm:$0xff]  ;;  %v2705_v48 = vld [vmem:[%s3143_s10] sm:$0xff]  ;;  %v539_v49 = vld [vmem:[%s2645_s19 + $0x2e8] sm:$0xff] }
  0xdd   : > { %v541_v50 = vld [vmem:[%s2645_s19 + $0x2f8] sm:$0xff]  ;;  %v716_v51 = vcombine.high %v2705_v48, %v2705_v48  ;;  %v1675_v52 = vpack.c.bf16 %v536_v47, %v534_v46  ;;  %v538_v55 = vld [vmem:[%s2645_s19 + $0x2e0] sm:$0xff]  ;;  %v540_v56 = vld [vmem:[%s2645_s19 + $0x2f0] sm:$0xff] }
  0xde   : > { %v1677_v54 = vpack.c.bf16 %v541_v50, %v539_v49  ;;  %v543_v57 = vld [vmem:[%s2645_s19 + $0x308] sm:$0xff]  ;;  %v545_v58 = vld [vmem:[%s2645_s19 + $0x318] sm:$0xff]  ;;  %v1679_v60 = vpack.c.bf16 %v540_v56, %v538_v55  ;;  %v542_v62 = vld [vmem:[%s2645_s19 + $0x300] sm:$0xff] }
  0xdf   : > { %1660 = vmatpush1.bf16.msra.mxu0 %v1659_v20  ;;  %v2712_v53 = vrot.slane %v716_v51, %v2698_v44  ;;  %v1681_v61 = vpack.c.bf16 %v545_v58, %v543_v57  ;;  %v544_v63 = vld [vmem:[%s2645_s19 + $0x310] sm:$0xff]  ;;  %v547_v0 = vld [vmem:[%s2645_s19 + $0x328] sm:$0xff]  ;;  %v549_v1 = vld [vmem:[%s2645_s19 + $0x338] sm:$0xff] }
  0xe0   : > { %1662 = vmatprep.subr.bf16.mxu0 %v1661_v21  ;;  %v1683_v2 = vpack.c.bf16 %v544_v63, %v542_v62  ;;  %v1685_v3 = vpack.c.bf16 %v549_v1, %v547_v0  ;;  %v546_v4 = vld [vmem:[%s2645_s19 + $0x320] sm:$0xff]  ;;  %v548_v5 = vld [vmem:[%s2645_s19 + $0x330] sm:$0xff]  ;;  %v551_v6 = vld [vmem:[%s2645_s19 + $0x348] sm:$0xff] }
  0xe1   : > { %v732_v59 = vcombine.high %v2712_v53, %v2712_v53  ;;  %v553_v7 = vld [vmem:[%s2645_s19 + $0x358] sm:$0xff]  ;;  %v1687_v8 = vpack.c.bf16 %v548_v5, %v546_v4  ;;  %v550_v10 = vld [vmem:[%s2645_s19 + $0x340] sm:$0xff]  ;;  %v552_v11 = vld [vmem:[%s2645_s19 + $0x350] sm:$0xff] }
  0xe2   : > { %v1689_v9 = vpack.c.bf16 %v553_v7, %v551_v6  ;;  %v555_v12 = vld [vmem:[%s2645_s19 + $0x368] sm:$0xff]  ;;  %v557_v13 = vld [vmem:[%s2645_s19 + $0x378] sm:$0xff]  ;;  %v1691_v14 = vpack.c.bf16 %v552_v11, %v550_v10  ;;  %v554_v16 = vld [vmem:[%s2645_s19 + $0x360] sm:$0xff] }
  0xe3   : > { %1664 = vmatpush1.bf16.msra.mxu0 %v1663_v26  ;;  %893 = vmatprep.mubr.f32.mxu0 %v732_v59  ;;  %v1693_v15 = vpack.c.bf16 %v557_v13, %v555_v12  ;;  %v556_v17 = vld [vmem:[%s2645_s19 + $0x370] sm:$0xff]  ;;  %v559_v18 = vld [vmem:[%s2645_s19 + $0x388] sm:$0xff]  ;;  %v561_v19 = vld [vmem:[%s2645_s19 + $0x398] sm:$0xff] }
  0xe4   : > { %1666 = vmatprep.subr.bf16.mxu0 %v1665_v30  ;;  %v447_v20 = vld [vmem:[%s2645_s19 + $0x8] sm:$0xff]  ;;  %v449_v21 = vld [vmem:[%s2645_s19 + $0x18] sm:$0xff]  ;;  %v446_v23 = vld [vmem:[%s2645_s19] sm:$0xff]  ;;  %v1695_v24 = vpack.c.bf16 %v556_v17, %v554_v16  ;;  %v1697_v27 = vpack.c.bf16 %v561_v19, %v559_v18  ;;  %v2781_v17 = vrot.slane %v2705_v48, %v2698_v44 }
  0xe5   : > { %v1585_v22 = vpack.c.bf16 %v449_v21, %v447_v20  ;;  %v558_v25 = vld [vmem:[%s2645_s19 + $0x380] sm:$0xff]  ;;  %v448_v26 = vld [vmem:[%s2645_s19 + $0x10] sm:$0xff]  ;;  %v451_v30 = vld [vmem:[%s2645_s19 + $0x28] sm:$0xff] }
  0xe6   : > { %v560_v28 = vld [vmem:[%s2645_s19 + $0x390] sm:$0xff]  ;;  %v1587_v29 = vpack.c.bf16 %v448_v26, %v446_v23  ;;  %v453_v31 = vld [vmem:[%s2645_s19 + $0x38] sm:$0xff]  ;;  %v563_v32 = vld [vmem:[%s2645_s19 + $0x3a8] sm:$0xff]  ;;  %v731_v26 = vcombine.high %v2781_v17, %v2781_v17 }
  0xe7   : > { %1668 = vmatpush1.bf16.msra.mxu0 %v1667_v35  ;;  %1586 = vmatprep.subr.bf16.mxu1 %v1585_v22  ;;  %v565_v33 = vld [vmem:[%s2645_s19 + $0x3b8] sm:$0xff]  ;;  %v1589_v34 = vpack.c.bf16 %v453_v31, %v451_v30  ;;  %v450_v35 = vld [vmem:[%s2645_s19 + $0x20] sm:$0xff]  ;;  %v452_v37 = vld [vmem:[%s2645_s19 + $0x30] sm:$0xff] }
  0xe8   : > { %1670 = vmatprep.subr.bf16.mxu0 %v1669_v38  ;;  %1588 = vmatpush1.bf16.msra.mxu1 %v1587_v29  ;;  %v1699_v38 = vpack.c.bf16 %v560_v28, %v558_v25  ;;  %v562_v39 = vld [vmem:[%s2645_s19 + $0x3a0] sm:$0xff]  ;;  %v1591_v40 = vpack.c.bf16 %v452_v37, %v450_v35  ;;  %v455_v41 = vld [vmem:[%s2645_s19 + $0x48] sm:$0xff]  ;;  %v457_v42 = vld [vmem:[%s2645_s19 + $0x58] sm:$0xff] }
  0xe9   : > { %1590 = vmatprep.subr.bf16.mxu1 %v1589_v34  ;;  %v1593_v46 = vpack.c.bf16 %v457_v42, %v455_v41  ;;  %v454_v47 = vld [vmem:[%s2645_s19 + $0x40] sm:$0xff]  ;;  %v456_v49 = vld [vmem:[%s2645_s19 + $0x50] sm:$0xff]  ;;  %v567_v50 = vld [vmem:[%s2645_s19 + $0x3c8] sm:$0xff]  ;;  %822 = vmatprep.mubr.f32.mxu1 %v731_v26 }
  0xea   : > { %v569_v51 = vld [vmem:[%s2645_s19 + $0x3d8] sm:$0xff]  ;;  %v566_v57 = vld [vmem:[%s2645_s19 + $0x3c0] sm:$0xff]  ;;  %v568_v62 = vld [vmem:[%s2645_s19 + $0x3d0] sm:$0xff] }
  0xeb   : > { %1672 = vmatpush1.bf16.msra.mxu0 %v1671_v43  ;;  %v1701_v43 = vpack.c.bf16 %v565_v33, %v563_v32  ;;  %v461_v55 = vld [vmem:[%s2645_s19 + $0x78] sm:$0xff]  ;;  %v458_v59 = vld [vmem:[%s2645_s19 + $0x60] sm:$0xff]  ;;  %v463_v63 = vld [vmem:[%s2645_s19 + $0x88] sm:$0xff]  ;;  %v1707_v5 = vpack.c.bf16 %v568_v62, %v566_v57 }
  0xec   : > { %1674 = vmatprep.subr.bf16.mxu0 %v1673_v45  ;;  %v564_v45 = vld [vmem:[%s2645_s19 + $0x3b0] sm:$0xff]  ;;  %1592 = vmatpush1.bf16.msra.mxu1 %v1591_v40  ;;  %v465_v0 = vld [vmem:[%s2645_s19 + $0x98] sm:$0xff]  ;;  %v571_v1 = vld [vmem:[%s2645_s19 + $0x3e8] sm:$0xff] }
  0xed   : > { %v1703_v56 = vpack.c.bf16 %v564_v45, %v562_v39  ;;  %1594 = vmatprep.subr.bf16.mxu1 %v1593_v46  ;;  %v572_v6 = vld [vmem:[%s2645_s19 + $0x3f0] sm:$0xff]  ;;  %v1601_v7 = vpack.c.bf16 %v465_v0, %v463_v63  ;;  %v2773_v11 = vld [vmem:[%s3143_s10 + $0x8] sm:$0xff]  ;;  %v469_v13 = vld [vmem:[%s2645_s19 + $0xb8] sm:$0xff] }
  0xee   : > { %v467_v12 = vld [vmem:[%s2645_s19 + $0xa8] sm:$0xff]  ;;  %v2785_v19 = vrot.slane %v2773_v11, %v2698_v44  ;;  %v466_v21 = vld [vmem:[%s2645_s19 + $0xa0] sm:$0xff]  ;;  %v468_v22 = vld [vmem:[%s2645_s19 + $0xb0] sm:$0xff] }
  0xef   : > { %1676 = vmatpush1.bf16.msra.mxu0 %v1675_v52  ;;  %v459_v52 = vld [vmem:[%s2645_s19 + $0x68] sm:$0xff]  ;;  %v1605_v20 = vpack.c.bf16 %v469_v13, %v467_v12  ;;  %v576_v25 = vld [vmem:[%s2645_s19 + $0x410] sm:$0xff]  ;;  %v473_v29 = vld [vmem:[%s2645_s19 + $0xd8] sm:$0xff]  ;;  %v1607_v30 = vpack.c.bf16 %v468_v22, %v466_v21 }
  0xf0   : > { %1678 = vmatprep.subr.bf16.mxu0 %v1677_v54  ;;  %v1595_v54 = vpack.c.bf16 %v456_v49, %v454_v47  ;;  %v1597_v58 = vpack.c.bf16 %v461_v55, %v459_v52  ;;  %v579_v48 = vld [vmem:[%s2645_s19 + $0x428] sm:$0xff]  ;;  %v578_v32 = vld [vmem:[%s2645_s19 + $0x420] sm:$0xff]  ;;  %v748_v33 = vcombine.high %v2785_v19, %v2785_v19  ;;  %v472_v35 = vld [vmem:[%s2645_s19 + $0xd0] sm:$0xff] }
  0xf1   : > { %v471_v28 = vld [vmem:[%s2645_s19 + $0xc8] sm:$0xff]  ;;  %v470_v34 = vld [vmem:[%s2645_s19 + $0xc0] sm:$0xff]  ;;  %v477_v41 = vld [vmem:[%s2645_s19 + $0xf8] sm:$0xff] }
  0xf2   : > { %1596 = vmatpush1.bf16.msra.mxu1 %v1595_v54  ;;  %v1609_v39 = vpack.c.bf16 %v473_v29, %v471_v28  ;;  %v475_v40 = vld [vmem:[%s2645_s19 + $0xe8] sm:$0xff]  ;;  %v1611_v45 = vpack.c.bf16 %v472_v35, %v470_v34  ;;  %v582_v47 = vld [vmem:[%s2645_s19 + $0x440] sm:$0xff]  ;;  %v584_v54 = vld [vmem:[%s2645_s19 + $0x450] sm:$0xff] }
  0xf3   : > { %1680 = vmatpush1.bf16.msra.mxu0 %v1679_v60  ;;  %v460_v60 = vld [vmem:[%s2645_s19 + $0x70] sm:$0xff]  ;;  %1598 = vmatprep.subr.bf16.mxu1 %v1597_v58  ;;  %v583_v42 = vld [vmem:[%s2645_s19 + $0x448] sm:$0xff]  ;;  %v1613_v49 = vpack.c.bf16 %v477_v41, %v475_v40  ;;  %v481_v55 = vld [vmem:[%s2645_s19 + $0x118] sm:$0xff] }
  0xf4   : > { %1682 = vmatprep.subr.bf16.mxu0 %v1681_v61  ;;  %v1705_v61 = vpack.c.bf16 %v569_v51, %v567_v50  ;;  %v1599_v4 = vpack.c.bf16 %v460_v60, %v458_v59  ;;  %v474_v50 = vld [vmem:[%s2645_s19 + $0xe0] sm:$0xff]  ;;  %v476_v51 = vld [vmem:[%s2645_s19 + $0xf0] sm:$0xff]  ;;  %v589_v57 = vld [vmem:[%s2645_s19 + $0x478] sm:$0xff]  ;;  %v1723_v59 = vpack.c.bf16 %v584_v54, %v582_v47 }
  0xf5   : > { %v1615_v58 = vpack.c.bf16 %v476_v51, %v474_v50  ;;  %v586_v60 = vld [vmem:[%s2645_s19 + $0x460] sm:$0xff]  ;;  %v480_v63 = vld [vmem:[%s2645_s19 + $0x110] sm:$0xff]  ;;  %v491_v28 = vld [vmem:[%s2645_s19 + $0x168] sm:$0xff] }
  0xf6   : > { %1600 = vmatpush1.bf16.msra.mxu1 %v1599_v4  ;;  %v478_v62 = vld [vmem:[%s2645_s19 + $0x100] sm:$0xff]  ;;  %v591_v4 = vld [vmem:[%s2645_s19 + $0x488] sm:$0xff]  ;;  %v484_v12 = vld [vmem:[%s2645_s19 + $0x130] sm:$0xff] }
  0xf7   : > { %1684 = vmatpush1.bf16.msra.mxu0 %v1683_v2  ;;  %v573_v2 = vld [vmem:[%s2645_s19 + $0x3f8] sm:$0xff]  ;;  %1602 = vmatprep.subr.bf16.mxu1 %v1601_v7  ;;  %v598_v34 = vld [vmem:[%s2645_s19 + $0x4c0] sm:$0xff]  ;;  %v600_v40 = vld [vmem:[%s2645_s19 + $0x4d0] sm:$0xff] }
  0xf8   : > { %1686 = vmatprep.subr.bf16.mxu0 %v1685_v3  ;;  %v570_v3 = vld [vmem:[%s2645_s19 + $0x3e0] sm:$0xff]  ;;  %v1709_v10 = vpack.c.bf16 %v573_v2, %v571_v1  ;;  %v588_v1 = vld [vmem:[%s2645_s19 + $0x470] sm:$0xff]  ;;  %v483_v2 = vld [vmem:[%s2645_s19 + $0x128] sm:$0xff]  ;;  %v1739_v47 = vpack.c.bf16 %v600_v40, %v598_v34 }
  0xf9   : > { %v1711_v18 = vpack.c.bf16 %v572_v6, %v570_v3  ;;  %v485_v3 = vld [vmem:[%s2645_s19 + $0x138] sm:$0xff]  ;;  %v1619_v6 = vpack.c.bf16 %v480_v63, %v478_v62  ;;  %v1727_v7 = vpack.c.bf16 %v588_v1, %v586_v60  ;;  %v495_v41 = vld [vmem:[%s2645_s19 + $0x188] sm:$0xff]  ;;  %v494_v51 = vld [vmem:[%s2645_s19 + $0x180] sm:$0xff] }
  0xfa   : > { %v493_v29 = vld [vmem:[%s2645_s19 + $0x178] sm:$0xff]  ;;  %v498_v63 = vld [vmem:[%s2645_s19 + $0x1a0] sm:$0xff] }
  0xfb   : > { %1688 = vmatpush1.bf16.msra.mxu0 %v1687_v8  ;;  %v462_v8 = vld [vmem:[%s2645_s19 + $0x80] sm:$0xff]  ;;  %v1629_v35 = vpack.c.bf16 %v493_v29, %v491_v28  ;;  %v616_v28 = vld [vmem:[%s2645_s19 + $0x550] sm:$0xff] }
  0xfc   : > { %1690 = vmatprep.subr.bf16.mxu0 %v1689_v9  ;;  %v464_v9 = vld [vmem:[%s2645_s19 + $0x90] sm:$0xff] }
  0xfd   : > { %v1603_v16 = vpack.c.bf16 %v464_v9, %v462_v8  ;;  %v590_v8 = vld [vmem:[%s2645_s19 + $0x480] sm:$0xff]  ;;  %v1621_v9 = vpack.c.bf16 %v485_v3, %v483_v2  ;;  %v608_v2 = vld [vmem:[%s2645_s19 + $0x510] sm:$0xff]  ;;  %v503_v3 = vld [vmem:[%s2645_s19 + $0x1c8] sm:$0xff] }
  0xfe   : > { %v1056_v29 = vld [vmem:[%s2658_s7 + $0x8] sm:$0xff] }
  0xff   : > { %1692 = vmatpush1.bf16.msra.mxu0 %v1691_v14  ;;  %v575_v14 = vld [vmem:[%s2645_s19 + $0x408] sm:$0xff]  ;;  %1604 = vmatpush1.bf16.msra.mxu1 %v1603_v16  ;;  %v489_v16 = vld [vmem:[%s2645_s19 + $0x158] sm:$0xff] }
 0x100   : > { %1694 = vmatprep.subr.bf16.mxu0 %v1693_v15  ;;  %v577_v15 = vld [vmem:[%s2645_s19 + $0x418] sm:$0xff]  ;;  %1606 = vmatprep.subr.bf16.mxu1 %v1605_v20 }
 0x101   : > { %v1713_v23 = vpack.c.bf16 %v577_v15, %v575_v14  ;;  %v592_v14 = vld [vmem:[%s2645_s19 + $0x490] sm:$0xff]  ;;  %v487_v15 = vld [vmem:[%s2645_s19 + $0x148] sm:$0xff]  ;;  %v597_v20 = vld [vmem:[%s2645_s19 + $0x4b8] sm:$0xff] }
 0x102   : > { %v1731_v22 = vpack.c.bf16 %v592_v14, %v590_v8 }
 0x103   : > { %1696 = vmatpush1.bf16.msra.mxu0 %v1695_v24  ;;  %v574_v24 = vld [vmem:[%s2645_s19 + $0x400] sm:$0xff]  ;;  %1608 = vmatpush1.bf16.msra.mxu1 %v1607_v30  ;;  %v599_v30 = vld [vmem:[%s2645_s19 + $0x4c8] sm:$0xff] }
 0x104   : > { %1698 = vmatprep.subr.bf16.mxu0 %v1697_v27  ;;  %v581_v27 = vld [vmem:[%s2645_s19 + $0x438] sm:$0xff]  ;;  %v1715_v31 = vpack.c.bf16 %v576_v25, %v574_v24  ;;  %1610 = vmatprep.subr.bf16.mxu1 %v1609_v39  ;;  %v1625_v24 = vpack.c.bf16 %v489_v16, %v487_v15  ;;  %v486_v25 = vld [vmem:[%s2645_s19 + $0x140] sm:$0xff]  ;;  %v612_v15 = vld [vmem:[%s2645_s19 + $0x530] sm:$0xff] }
 0x105   : > { %v1717_v37 = vpack.c.bf16 %v581_v27, %v579_v48  ;;  %v488_v48 = vld [vmem:[%s2645_s19 + $0x150] sm:$0xff]  ;;  %v507_v16 = vld [vmem:[%s2645_s19 + $0x1e8] sm:$0xff] }
 0x106   : > { %v596_v27 = vld [vmem:[%s2645_s19 + $0x4b0] sm:$0xff] }
 0x107   : > { %1700 = vmatpush1.bf16.msra.mxu0 %v1699_v38  ;;  %v580_v38 = vld [vmem:[%s2645_s19 + $0x430] sm:$0xff]  ;;  %1612 = vmatpush1.bf16.msra.mxu1 %v1611_v45  ;;  %v605_v45 = vld [vmem:[%s2645_s19 + $0x4f8] sm:$0xff] }
 0x108   : > { %1702 = vmatprep.subr.bf16.mxu0 %v1701_v43  ;;  %v585_v43 = vld [vmem:[%s2645_s19 + $0x458] sm:$0xff]  ;;  %v1719_v46 = vpack.c.bf16 %v580_v38, %v578_v32  ;;  %1614 = vmatprep.subr.bf16.mxu1 %v1613_v49  ;;  %v1627_v32 = vpack.c.bf16 %v488_v48, %v486_v25  ;;  %v492_v38 = vld [vmem:[%s2645_s19 + $0x170] sm:$0xff]  ;;  %v602_v49 = vld [vmem:[%s2645_s19 + $0x4e0] sm:$0xff] }
 0x109   : > { %v1721_v52 = vpack.c.bf16 %v585_v43, %v583_v42  ;;  %v497_v42 = vld [vmem:[%s2645_s19 + $0x198] sm:$0xff]  ;;  %v603_v43 = vld [vmem:[%s2645_s19 + $0x4e8] sm:$0xff]  ;;  %v506_v48 = vld [vmem:[%s2645_s19 + $0x1e0] sm:$0xff] }
 0x10a   : > { %v1633_v50 = vpack.c.bf16 %v497_v42, %v495_v41  ;;  %v1741_v54 = vpack.c.bf16 %v605_v45, %v603_v43  ;;  %v620_v41 = vld [vmem:[%s2645_s19 + $0x570] sm:$0xff]  ;;  %v1062_v43 = vld [vmem:[%s2658_s7 + $0x38] sm:$0xff]  ;;  %v623_v45 = vld [vmem:[%s2645_s19 + $0x588] sm:$0xff] }
 0x10b   : > { %1704 = vmatpush1.bf16.msra.mxu0 %v1703_v56  ;;  %v587_v56 = vld [vmem:[%s2645_s19 + $0x468] sm:$0xff]  ;;  %1616 = vmatpush1.bf16.msra.mxu1 %v1615_v58  ;;  %v609_v58 = vld [vmem:[%s2645_s19 + $0x518] sm:$0xff] }
 0x10c   : > { %1706 = vmatprep.subr.bf16.mxu0 %v1705_v61  ;;  %v1725_v0 = vpack.c.bf16 %v589_v57, %v587_v56  ;;  %v501_v56 = vld [vmem:[%s2645_s19 + $0x1b8] sm:$0xff]  ;;  %v607_v57 = vld [vmem:[%s2645_s19 + $0x508] sm:$0xff] }
 0x10d   : > { %v1745_v1 = vpack.c.bf16 %v609_v58, %v607_v57  ;;  %v1060_v42 = vld [vmem:[%s2658_s7 + $0x28] sm:$0xff]  ;;  %v1066_v57 = vld [vmem:[%s2658_s7 + $0x58] sm:$0xff] }
 0x10e   : > { %v627_v58 = vld [vmem:[%s2645_s19 + $0x5a8] sm:$0xff] }
 0x10f   : > { %1708 = vmatpush1.bf16.msra.mxu0 %v1707_v5  ;;  %v593_v5 = vld [vmem:[%s2645_s19 + $0x498] sm:$0xff] }
 0x110   : > { %1710 = vmatprep.subr.bf16.mxu0 %v1709_v10  ;;  %v482_v10 = vld [vmem:[%s2645_s19 + $0x120] sm:$0xff]  ;;  %v1729_v13 = vpack.c.bf16 %v593_v5, %v591_v4  ;;  %v505_v4 = vld [vmem:[%s2645_s19 + $0x1d8] sm:$0xff]  ;;  %v611_v5 = vld [vmem:[%s2645_s19 + $0x528] sm:$0xff] }
 0x111   : > { %v1623_v21 = vpack.c.bf16 %v484_v12, %v482_v10  ;;  %v1641_v10 = vpack.c.bf16 %v505_v4, %v503_v3  ;;  %v502_v12 = vld [vmem:[%s2645_s19 + $0x1c0] sm:$0xff]  ;;  %v628_v3 = vld [vmem:[%s2645_s19 + $0x5b0] sm:$0xff] }
 0x112   : > { %v1068_v4 = vld [vmem:[%s2658_s7 + $0x68] sm:$0xff] }
 0x113   : > { %1712 = vmatpush1.bf16.msra.mxu0 %v1711_v18  ;;  %v595_v18 = vld [vmem:[%s2645_s19 + $0x4a8] sm:$0xff] }
 0x114   : > { %1714 = vmatprep.subr.bf16.mxu0 %v1713_v23  ;;  %v594_v23 = vld [vmem:[%s2645_s19 + $0x4a0] sm:$0xff]  ;;  %v1733_v26 = vpack.c.bf16 %v597_v20, %v595_v18  ;;  %v509_v18 = vld [vmem:[%s2645_s19 + $0x1f8] sm:$0xff]  ;;  %v615_v20 = vld [vmem:[%s2645_s19 + $0x548] sm:$0xff] }
 0x115   : > { %v1645_v25 = vpack.c.bf16 %v509_v18, %v507_v16  ;;  %v1072_v16 = vld [vmem:[%s2658_s7 + $0x88] sm:$0xff]  ;;  %v1074_v18 = vld [vmem:[%s2658_s7 + $0x98] sm:$0xff] }
 0x116   : > { %894 = vmatmul.mubr.f32.vlgmr.msra.gmra.mrb[0].mxu0 %v2712_v53  ;;  %v479_v53 = vld [vmem:[%s2645_s19 + $0x108] sm:$0xff] }
 0x117   : > { %1716 = vmatpush1.bf16.msra.mxu0 %v1715_v31  ;;  %964 = vmatprep.mubr.f32.mxu0 %v748_v33  ;;  %v1617_v61 = vpack.c.bf16 %v481_v55, %v479_v53  ;;  %v601_v31 = vld [vmem:[%s2645_s19 + $0x4d8] sm:$0xff]  ;;  %v1735_v33 = vpack.c.bf16 %v596_v27, %v594_v23  ;;  %v604_v53 = vld [vmem:[%s2645_s19 + $0x4f0] sm:$0xff]  ;;  %v499_v55 = vld [vmem:[%s2645_s19 + $0x1a8] sm:$0xff] }
 0x118   : > { %1718 = vmatprep.subr.bf16.mxu0 %v1717_v37  ;;  %v490_v37 = vld [vmem:[%s2645_s19 + $0x160] sm:$0xff]  ;;  %v1737_v39 = vpack.c.bf16 %v601_v31, %v599_v30  ;;  %v1743_v60 = vpack.c.bf16 %v604_v53, %v602_v49  ;;  %v1637_v62 = vpack.c.bf16 %v501_v56, %v499_v55  ;;  %v619_v31 = vld [vmem:[%s2645_s19 + $0x568] sm:$0xff]  ;;  %v624_v55 = vld [vmem:[%s2645_s19 + $0x590] sm:$0xff] }
 0x119   : > { %1618 = vmatprep.subr.bf16.mxu1 %v1617_v61  ;;  %v606_v61 = vld [vmem:[%s2645_s19 + $0x500] sm:$0xff]  ;;  %v1064_v56 = vld [vmem:[%s2658_s7 + $0x48] sm:$0xff] }
 0x11a   : > { %1620 = vmatpush1.bf16.msra.mxu1 %v1619_v6  ;;  %v613_v6 = vld [vmem:[%s2645_s19 + $0x538] sm:$0xff]  ;;  %v1747_v8 = vpack.c.bf16 %v608_v2, %v606_v61 }
 0x11b   : > { %1720 = vmatpush1.bf16.msra.mxu0 %v1719_v46  ;;  %1622 = vmatprep.subr.bf16.mxu1 %v1621_v9  ;;  %v1631_v46 = vpack.c.bf16 %v492_v38, %v490_v37  ;;  %v610_v9 = vld [vmem:[%s2645_s19 + $0x520] sm:$0xff]  ;;  %v1749_v14 = vpack.c.bf16 %v613_v6, %v611_v5  ;;  %v631_v5 = vld [vmem:[%s2645_s19 + $0x5c8] sm:$0xff]  ;;  %v633_v6 = vld [vmem:[%s2645_s19 + $0x5d8] sm:$0xff] }
 0x11c   : > { %1722 = vmatprep.subr.bf16.mxu0 %v1721_v52  ;;  %v496_v52 = vld [vmem:[%s2645_s19 + $0x190] sm:$0xff]  ;;  %v1751_v23 = vpack.c.bf16 %v612_v15, %v610_v9  ;;  %v1058_v30 = vld [vmem:[%s2658_s7 + $0x18] sm:$0xff]  ;;  %v1055_v38 = vld [vmem:[%s2658_s7] sm:$0xff] }
 0x11d   : > { %v1841_v37 = vpack.c.bf16 %v1058_v30, %v1056_v29  ;;  %v630_v9 = vld [vmem:[%s2645_s19 + $0x5c0] sm:$0xff]  ;;  %v632_v15 = vld [vmem:[%s2645_s19 + $0x5d0] sm:$0xff] }
 0x11e   : > { %1624 = vmatpush1.bf16.msra.mxu1 %v1623_v21  ;;  %v617_v21 = vld [vmem:[%s2645_s19 + $0x558] sm:$0xff]  ;;  %v636_v29 = vld [vmem:[%s2645_s19 + $0x5f0] sm:$0xff] }
 0x11f   : > { %1724 = vmatpush1.bf16.msra.mxu0 %v1723_v59  ;;  %1626 = vmatprep.subr.bf16.mxu1 %v1625_v24  ;;  %v1635_v59 = vpack.c.bf16 %v496_v52, %v494_v51  ;;  %v614_v24 = vld [vmem:[%s2645_s19 + $0x540] sm:$0xff]  ;;  %v1753_v27 = vpack.c.bf16 %v617_v21, %v615_v20  ;;  %v1845_v51 = vpack.c.bf16 %v1062_v43, %v1060_v42  ;;  %v635_v20 = vld [vmem:[%s2645_s19 + $0x5e8] sm:$0xff]  ;;  %v637_v21 = vld [vmem:[%s2645_s19 + $0x5f8] sm:$0xff] }
 0x120   : > { %1726 = vmatprep.subr.bf16.mxu0 %v1725_v0  ;;  %v500_v0 = vld [vmem:[%s2645_s19 + $0x1b0] sm:$0xff]  ;;  %v1755_v34 = vpack.c.bf16 %v616_v28, %v614_v24  ;;  %v1059_v52 = vld [vmem:[%s2658_s7 + $0x20] sm:$0xff]  ;;  %v1773_v28 = vpack.c.bf16 %v637_v21, %v635_v20  ;;  %v661_v21 = vld [vmem:[%s2645_s19 + $0x6b8] sm:$0xff] }
 0x121   : > { %v634_v24 = vld [vmem:[%s2645_s19 + $0x5e0] sm:$0xff]  ;;  %v1076_v30 = vld [vmem:[%s2658_s7 + $0xa8] sm:$0xff] }
 0x122   : > { %1628 = vmatpush1.bf16.msra.mxu1 %v1627_v32  ;;  %v621_v32 = vld [vmem:[%s2645_s19 + $0x578] sm:$0xff]  ;;  %v640_v42 = vld [vmem:[%s2645_s19 + $0x610] sm:$0xff]  ;;  %v643_v43 = vld [vmem:[%s2645_s19 + $0x628] sm:$0xff] }
 0x123   : > { %1728 = vmatpush1.bf16.msra.mxu0 %v1727_v7  ;;  %1630 = vmatprep.subr.bf16.mxu1 %v1629_v35  ;;  %v1639_v7 = vpack.c.bf16 %v500_v0, %v498_v63  ;;  %v618_v35 = vld [vmem:[%s2645_s19 + $0x560] sm:$0xff]  ;;  %v1757_v40 = vpack.c.bf16 %v621_v32, %v619_v31  ;;  %v1849_v63 = vpack.c.bf16 %v1066_v57, %v1064_v56  ;;  %v639_v32 = vld [vmem:[%s2645_s19 + $0x608] sm:$0xff]  ;;  %v644_v56 = vld [vmem:[%s2645_s19 + $0x630] sm:$0xff] }
 0x124   : > { %1730 = vmatprep.subr.bf16.mxu0 %v1729_v13  ;;  %v504_v13 = vld [vmem:[%s2645_s19 + $0x1d0] sm:$0xff]  ;;  %v1759_v49 = vpack.c.bf16 %v620_v41, %v618_v35  ;;  %v1063_v0 = vld [vmem:[%s2658_s7 + $0x40] sm:$0xff]  ;;  %v1078_v31 = vld [vmem:[%s2658_s7 + $0xb8] sm:$0xff] }
 0x125   : > { %v638_v41 = vld [vmem:[%s2645_s19 + $0x600] sm:$0xff]  ;;  %v659_v20 = vld [vmem:[%s2645_s19 + $0x6a8] sm:$0xff] }
 0x126   : > { %1632 = vmatpush1.bf16.msra.mxu1 %v1631_v46  ;;  %v625_v46 = vld [vmem:[%s2645_s19 + $0x598] sm:$0xff] }
 0x127   : > { %1732 = vmatpush1.bf16.msra.mxu0 %v1731_v22  ;;  %1634 = vmatprep.subr.bf16.mxu1 %v1633_v50  ;;  %v1643_v22 = vpack.c.bf16 %v504_v13, %v502_v12  ;;  %v622_v50 = vld [vmem:[%s2645_s19 + $0x580] sm:$0xff]  ;;  %v1761_v53 = vpack.c.bf16 %v625_v46, %v623_v45  ;;  %v1069_v13 = vld [vmem:[%s2658_s7 + $0x70] sm:$0xff]  ;;  %v1080_v46 = vld [vmem:[%s2658_s7 + $0xc8] sm:$0xff] }
 0x128   : > { %1734 = vmatprep.subr.bf16.mxu0 %v1733_v26  ;;  %v508_v26 = vld [vmem:[%s2645_s19 + $0x1f0] sm:$0xff]  ;;  %v1763_v61 = vpack.c.bf16 %v624_v55, %v622_v50  ;;  %v1067_v12 = vld [vmem:[%s2658_s7 + $0x60] sm:$0xff]  ;;  %v645_v45 = vld [vmem:[%s2645_s19 + $0x638] sm:$0xff]  ;;  %v1779_v50 = vpack.c.bf16 %v640_v42, %v638_v41 }
 0x129   : > { %v1781_v55 = vpack.c.bf16 %v645_v45, %v643_v43  ;;  %v670_v42 = vld [vmem:[%s2645_s19 + $0x700] sm:$0xff]  ;;  %v672_v43 = vld [vmem:[%s2645_s19 + $0x710] sm:$0xff]  ;;  %v675_v45 = vld [vmem:[%s2645_s19 + $0x728] sm:$0xff] }
 0x12a   : > { %1636 = vmatpush1.bf16.msra.mxu1 %v1635_v59  ;;  %v629_v59 = vld [vmem:[%s2645_s19 + $0x5b8] sm:$0xff] }
 0x12b   : > { %1736 = vmatpush1.bf16.msra.mxu0 %v1735_v33  ;;  %1638 = vmatprep.subr.bf16.mxu1 %v1637_v62  ;;  %v1647_v33 = vpack.c.bf16 %v508_v26, %v506_v48  ;;  %v626_v62 = vld [vmem:[%s2645_s19 + $0x5a0] sm:$0xff]  ;;  %v1765_v2 = vpack.c.bf16 %v629_v59, %v627_v58  ;;  %v1857_v48 = vpack.c.bf16 %v1074_v18, %v1072_v16  ;;  %v1084_v58 = vld [vmem:[%s2658_s7 + $0xe8] sm:$0xff] }
 0x12c   : > { %1738 = vmatprep.subr.bf16.mxu0 %v1737_v39  ;;  %v1057_v39 = vld [vmem:[%s2658_s7 + $0x10] sm:$0xff]  ;;  %v1071_v26 = vld [vmem:[%s2658_s7 + $0x80] sm:$0xff]  ;;  %v1086_v59 = vld [vmem:[%s2658_s7 + $0xf8] sm:$0xff] }
 0x12d   : > { %v654_v16 = vld [vmem:[%s2645_s19 + $0x680] sm:$0xff]  ;;  %v656_v18 = vld [vmem:[%s2645_s19 + $0x690] sm:$0xff] }
 0x12e   : > { %1640 = vmatpush1.bf16.msra.mxu1 %v1639_v7 }
 0x12f   : > { %1740 = vmatpush1.bf16.msra.mxu0 %v1739_v47  ;;  %1642 = vmatprep.subr.bf16.mxu1 %v1641_v10  ;;  %v1843_v47 = vpack.c.bf16 %v1057_v39, %v1055_v38  ;;  %v1075_v38 = vld [vmem:[%s2658_s7 + $0xa0] sm:$0xff]  ;;  %v1077_v39 = vld [vmem:[%s2658_s7 + $0xb0] sm:$0xff] }
 0x130   : > { %1742 = vmatprep.subr.bf16.mxu0 %v1741_v54  ;;  %v1061_v54 = vld [vmem:[%s2658_s7 + $0x30] sm:$0xff] }
 0x132   : > { %1644 = vmatpush1.bf16.msra.mxu1 %v1643_v22  ;;  %v1855_v22 = vpack.c.bf16 %v1069_v13, %v1067_v12  ;;  %v655_v12 = vld [vmem:[%s2645_s19 + $0x688] sm:$0xff]  ;;  %v657_v13 = vld [vmem:[%s2645_s19 + $0x698] sm:$0xff] }
 0x133   : > { %1744 = vmatpush1.bf16.msra.mxu0 %v1743_v60  ;;  %1646 = vmatprep.subr.bf16.mxu1 %v1645_v25  ;;  %v1847_v60 = vpack.c.bf16 %v1061_v54, %v1059_v52  ;;  %v733_v25 = vcombine.high %v2773_v11, %v2773_v11  ;;  %v1079_v54 = vld [vmem:[%s2658_s7 + $0xc0] sm:$0xff] }
 0x134   : > { %1746 = vmatprep.subr.bf16.mxu0 %v1745_v1  ;;  %v1065_v1 = vld [vmem:[%s2658_s7 + $0x50] sm:$0xff] }
 0x135   : > { %v1851_v7 = vpack.c.bf16 %v1065_v1, %v1063_v0  ;;  %v2924_v35 = vrot.slane %v733_v25, %v2698_v44  ;;  %v1869_v0 = vpack.c.bf16 %v1086_v59, %v1084_v58  ;;  %v1083_v1 = vld [vmem:[%s2658_s7 + $0xe0] sm:$0xff]  ;;  %v660_v25 = vld [vmem:[%s2645_s19 + $0x6b0] sm:$0xff]  ;;  %v685_v59 = vld [vmem:[%s2645_s19 + $0x778] sm:$0xff] }
 0x136   : > { %1648 = vmatpush1.bf16.msra.mxu1 %v1647_v33  ;;  %v641_v33 = vld [vmem:[%s2645_s19 + $0x618] sm:$0xff]  ;;  %v683_v58 = vld [vmem:[%s2645_s19 + $0x768] sm:$0xff] }
 0x137   : > { %1748 = vmatpush1.bf16.msra.mxu0 %v1747_v8  ;;  %1842 = vmatprep.subr.bf16.mxu1 %v1841_v37  ;;  %v1767_v8 = vpack.c.bf16 %v628_v3, %v626_v62  ;;  %v1861_v37 = vpack.c.bf16 %v1078_v31, %v1076_v30  ;;  %v749_v52 = vcombine.high %v2924_v35, %v2924_v35  ;;  %v664_v30 = vld [vmem:[%s2645_s19 + $0x6d0] sm:$0xff]  ;;  %v667_v31 = vld [vmem:[%s2645_s19 + $0x6e8] sm:$0xff] }
 0x138   : > { %1750 = vmatprep.subr.bf16.mxu0 %v1749_v14  ;;  %v1769_v14 = vpack.c.bf16 %v633_v6, %v631_v5  ;;  %v651_v5 = vld [vmem:[%s2645_s19 + $0x668] sm:$0xff]  ;;  %v653_v6 = vld [vmem:[%s2645_s19 + $0x678] sm:$0xff] }
 0x139   : > { %823 = vmatmul.mubr.f32.vlgmr.msra.gmra.mrb[0].mxu1 %v2781_v17  ;;  %v1070_v17 = vld [vmem:[%s2658_s7 + $0x78] sm:$0xff] }
 0x13a   : > { %1844 = vmatpush1.bf16.msra.mxu1 %v1843_v47  ;;  %v1853_v10 = vpack.c.bf16 %v1070_v17, %v1068_v4  ;;  %v1082_v47 = vld [vmem:[%s2658_s7 + $0xd8] sm:$0xff]  ;;  %v648_v17 = vld [vmem:[%s2645_s19 + $0x650] sm:$0xff] }
 0x13b   : > { %1752 = vmatpush1.bf16.msra.mxu0 %v1751_v23  ;;  %1846 = vmatprep.subr.bf16.mxu1 %v1845_v51  ;;  %v1771_v23 = vpack.c.bf16 %v632_v15, %v630_v9  ;;  %v642_v51 = vld [vmem:[%s2645_s19 + $0x620] sm:$0xff]  ;;  %v1865_v57 = vpack.c.bf16 %v1082_v47, %v1080_v46  ;;  %v1793_v15 = vpack.c.bf16 %v657_v13, %v655_v12  ;;  %v677_v46 = vld [vmem:[%s2645_s19 + $0x738] sm:$0xff] }
 0x13c   : > { %1754 = vmatprep.subr.bf16.mxu0 %v1753_v27  ;;  %v1073_v27 = vld [vmem:[%s2658_s7 + $0x90] sm:$0xff]  ;;  %v646_v4 = vld [vmem:[%s2645_s19 + $0x640] sm:$0xff]  ;;  %v1811_v47 = vpack.c.bf16 %v672_v43, %v670_v42  ;;  %v1100_v43 = vld [vmem:[%s2658_s7 + $0x168] sm:$0xff] }
 0x13d   : > { %v1859_v11 = vpack.c.bf16 %v1073_v27, %v1071_v26  ;;  %v650_v9 = vld [vmem:[%s2645_s19 + $0x660] sm:$0xff]  ;;  %v665_v26 = vld [vmem:[%s2645_s19 + $0x6d8] sm:$0xff] }
 0x13e   : > { %1848 = vmatpush1.bf16.msra.mxu1 %v1847_v60  ;;  %v647_v60 = vld [vmem:[%s2645_s19 + $0x648] sm:$0xff]  ;;  %v697_v12 = vld [vmem:[%s2645_s19 + $0x7d8] sm:$0xff] }
 0x13f   : > { %1756 = vmatpush1.bf16.msra.mxu0 %v1755_v34  ;;  %1850 = vmatprep.subr.bf16.mxu1 %v1849_v63  ;;  %v1775_v34 = vpack.c.bf16 %v636_v29, %v634_v24  ;;  %v1783_v63 = vpack.c.bf16 %v644_v56, %v642_v51  ;;  %v658_v24 = vld [vmem:[%s2645_s19 + $0x6a0] sm:$0xff]  ;;  %v676_v51 = vld [vmem:[%s2645_s19 + $0x730] sm:$0xff] }
 0x140   : > { %1758 = vmatprep.subr.bf16.mxu0 %v1757_v40  ;;  %v1777_v40 = vpack.c.bf16 %v641_v33, %v639_v32  ;;  %v1799_v27 = vpack.c.bf16 %v660_v25, %v658_v24  ;;  %v662_v29 = vld [vmem:[%s2645_s19 + $0x6c0] sm:$0xff]  ;;  %v669_v32 = vld [vmem:[%s2645_s19 + $0x6f8] sm:$0xff]  ;;  %v700_v24 = vld [vmem:[%s2645_s19 + $0x7f0] sm:$0xff] }
 0x141   : > { %v1803_v33 = vpack.c.bf16 %v664_v30, %v662_v29  ;;  %v678_v56 = vld [vmem:[%s2645_s19 + $0x740] sm:$0xff]  ;;  %v1089_v29 = vld [vmem:[%s2658_s7 + $0x110] sm:$0xff] }
 0x142   : > { %1852 = vmatpush1.bf16.msra.mxu1 %v1851_v7  ;;  %v1787_v7 = vpack.c.bf16 %v648_v17, %v646_v4  ;;  %v686_v4 = vld [vmem:[%s2645_s19 + $0x780] sm:$0xff]  ;;  %v688_v17 = vld [vmem:[%s2645_s19 + $0x790] sm:$0xff] }
 0x143   : > { %1760 = vmatpush1.bf16.msra.mxu0 %v1759_v49  ;;  %1854 = vmatprep.subr.bf16.mxu1 %v1853_v10  ;;  %v1863_v49 = vpack.c.bf16 %v1077_v39, %v1075_v38  ;;  %v652_v10 = vld [vmem:[%s2645_s19 + $0x670] sm:$0xff]  ;;  %v671_v38 = vld [vmem:[%s2645_s19 + $0x708] sm:$0xff]  ;;  %v673_v39 = vld [vmem:[%s2645_s19 + $0x718] sm:$0xff] }
 0x144   : > { %1762 = vmatprep.subr.bf16.mxu0 %v1761_v53  ;;  %v1081_v53 = vld [vmem:[%s2658_s7 + $0xd0] sm:$0xff]  ;;  %v1809_v41 = vpack.c.bf16 %v673_v39, %v671_v38  ;;  %v1098_v38 = vld [vmem:[%s2658_s7 + $0x158] sm:$0xff] }
 0x145   : > { %v1867_v62 = vpack.c.bf16 %v1081_v53, %v1079_v54  ;;  %v681_v54 = vld [vmem:[%s2645_s19 + $0x758] sm:$0xff] }
 0x146   : > { %1856 = vmatpush1.bf16.msra.mxu1 %v1855_v22  ;;  %v1795_v22 = vpack.c.bf16 %v656_v18, %v654_v16  ;;  %v696_v16 = vld [vmem:[%s2645_s19 + $0x7d0] sm:$0xff]  ;;  %v699_v18 = vld [vmem:[%s2645_s19 + $0x7e8] sm:$0xff] }
 0x147   : > { %1764 = vmatpush1.bf16.msra.mxu0 %v1763_v61  ;;  %1858 = vmatprep.subr.bf16.mxu1 %v1857_v48  ;;  %v649_v61 = vld [vmem:[%s2645_s19 + $0x658] sm:$0xff]  ;;  %v663_v48 = vld [vmem:[%s2645_s19 + $0x6c8] sm:$0xff] }
 0x148   : > { %1766 = vmatprep.subr.bf16.mxu0 %v1765_v2  ;;  %v1085_v2 = vld [vmem:[%s2658_s7 + $0xf0] sm:$0xff]  ;;  %v1785_v3 = vpack.c.bf16 %v649_v61, %v647_v60  ;;  %v1821_v61 = vpack.c.bf16 %v685_v59, %v683_v58  ;;  %v1110_v58 = vld [vmem:[%s2658_s7 + $0x1b8] sm:$0xff] }
 0x14a   : > { %1860 = vmatpush1.bf16.msra.mxu1 %v1859_v11  ;;  %v1805_v11 = vpack.c.bf16 %v669_v32, %v667_v31  ;;  %v1092_v31 = vld [vmem:[%s2658_s7 + $0x128] sm:$0xff]  ;;  %v1094_v32 = vld [vmem:[%s2658_s7 + $0x138] sm:$0xff] }
 0x14b   : > { %1768 = vmatpush1.bf16.msra.mxu0 %v1767_v8  ;;  %1862 = vmatprep.subr.bf16.mxu1 %v1861_v37  ;;  %v1789_v8 = vpack.c.bf16 %v653_v6, %v651_v5  ;;  %v668_v37 = vld [vmem:[%s2645_s19 + $0x6f0] sm:$0xff]  ;;  %v691_v5 = vld [vmem:[%s2645_s19 + $0x7a8] sm:$0xff]  ;;  %v693_v6 = vld [vmem:[%s2645_s19 + $0x7b8] sm:$0xff] }
 0x14c   : > { %1770 = vmatprep.subr.bf16.mxu0 %v1769_v14  ;;  %v1791_v14 = vpack.c.bf16 %v652_v10, %v650_v9  ;;  %v692_v9 = vld [vmem:[%s2645_s19 + $0x7b0] sm:$0xff]  ;;  %v695_v10 = vld [vmem:[%s2645_s19 + $0x7c8] sm:$0xff] }
 0x14e   : > { %1864 = vmatpush1.bf16.msra.mxu1 %v1863_v49  ;;  %v1813_v49 = vpack.c.bf16 %v677_v46, %v675_v45  ;;  %v1102_v45 = vld [vmem:[%s2658_s7 + $0x178] sm:$0xff] }
 0x14f   : > { %1772 = vmatpush1.bf16.msra.mxu0 %v1771_v23  ;;  %1866 = vmatprep.subr.bf16.mxu1 %v1865_v57  ;;  %v1797_v23 = vpack.c.bf16 %v661_v21, %v659_v20  ;;  %v680_v57 = vld [vmem:[%s2645_s19 + $0x750] sm:$0xff]  ;;  %v701_v20 = vld [vmem:[%s2645_s19 + $0x7f8] sm:$0xff]  ;;  %v1885_v46 = vpack.c.bf16 %v1102_v45, %v1100_v43 }
 0x150   : > { %1774 = vmatprep.subr.bf16.mxu0 %v1773_v28  ;;  %v1801_v28 = vpack.c.bf16 %v665_v26, %v663_v48  ;;  %v1819_v60 = vpack.c.bf16 %v680_v57, %v678_v56  ;;  %v1088_v48 = vld [vmem:[%s2658_s7 + $0x108] sm:$0xff]  ;;  %v1090_v26 = vld [vmem:[%s2658_s7 + $0x118] sm:$0xff] }
 0x151   : > { %v1108_v57 = vld [vmem:[%s2658_s7 + $0x1a8] sm:$0xff]  ;;  %v1252_v43 = vld [vmem:[#allocation11 + $0x90] sm:$0xff] (!%p1539_p0)  ;;  %v1253_v45 = vld [vmem:[#allocation11 + $0x98] sm:$0xff] (!%p1539_p0) }
 0x152   : > { %1868 = vmatpush1.bf16.msra.mxu1 %v1867_v62  ;;  %v682_v62 = vld [vmem:[%s2645_s19 + $0x760] sm:$0xff]  ;;  %v1893_v59 = vpack.c.bf16 %v1110_v58, %v1108_v57  ;;  %v1256_v57 = vld [vmem:[#allocation11 + $0xb0] sm:$0xff] (!%p1539_p0) }
 0x153   : > { %1776 = vmatpush1.bf16.msra.mxu0 %v1775_v34  ;;  %1870 = vmatprep.subr.bf16.mxu1 %v1869_v0  ;;  %v666_v34 = vld [vmem:[%s2645_s19 + $0x6e0] sm:$0xff]  ;;  %v687_v0 = vld [vmem:[%s2645_s19 + $0x788] sm:$0xff] }
 0x154   : > { %1778 = vmatprep.subr.bf16.mxu0 %v1777_v40  ;;  %v1807_v40 = vpack.c.bf16 %v668_v37, %v666_v34  ;;  %v1096_v37 = vld [vmem:[%s2658_s7 + $0x148] sm:$0xff]  ;;  %v1257_v58 = vld [vmem:[#allocation11 + $0xb8] sm:$0xff] (!%p1539_p0) }
 0x155   : > { %v1881_v39 = vpack.c.bf16 %v1098_v38, %v1096_v37  ;;  %v1250_v38 = vld [vmem:[#allocation11 + $0x80] sm:$0xff] (!%p1539_p0) }
 0x156   : > { %965 = vmatmul.mubr.f32.vlgmr.msra.gmra.mrb[0].mxu0 %v2785_v19  ;;  %v1871_v19 = vpack.c.bf16 %v1085_v2, %v1083_v1  ;;  %v689_v1 = vld [vmem:[%s2645_s19 + $0x798] sm:$0xff] }
 0x157   : > { %1780 = vmatpush1.bf16.msra.mxu0 %v1779_v50  ;;  %1035 = vmatprep.mubr.f32.mxu0 %v749_v52  ;;  %v674_v50 = vld [vmem:[%s2645_s19 + $0x720] sm:$0xff]  ;;  %v679_v52 = vld [vmem:[%s2645_s19 + $0x748] sm:$0xff] }
 0x158   : > { %1782 = vmatprep.subr.bf16.mxu0 %v1781_v55  ;;  %1872 = vmatpush1.bf16.msra.mxu1 %v1871_v19  ;;  %v1815_v53 = vpack.c.bf16 %v676_v51, %v674_v50  ;;  %v1817_v55 = vpack.c.bf16 %v681_v54, %v679_v52  ;;  %v1827_v19 = vpack.c.bf16 %v688_v17, %v686_v4  ;;  %v1104_v51 = vld [vmem:[%s2658_s7 + $0x188] sm:$0xff]  ;;  %v1106_v52 = vld [vmem:[%s2658_s7 + $0x198] sm:$0xff] }
 0x159   : > { %v1889_v54 = vpack.c.bf16 %v1106_v52, %v1104_v51  ;;  %v1116_v4 = vld [vmem:[%s2658_s7 + $0x1e8] sm:$0xff]  ;;  %v1118_v17 = vld [vmem:[%s2658_s7 + $0x1f8] sm:$0xff] }
 0x15a   : > { %v1254_v51 = vld [vmem:[#allocation11 + $0xa0] sm:$0xff] (!%p1539_p0)  ;;  %v1255_v52 = vld [vmem:[#allocation11 + $0xa8] sm:$0xff] (!%p1539_p0) }
 0x15b   : > { %1784 = vmatpush1.bf16.msra.mxu0 %v1783_v63  ;;  %v684_v63 = vld [vmem:[%s2645_s19 + $0x770] sm:$0xff] }
 0x15c   : > { %1786 = vmatprep.subr.bf16.mxu0 %v1785_v3  ;;  %v1823_v2 = vpack.c.bf16 %v684_v63, %v682_v62  ;;  %v1825_v3 = vpack.c.bf16 %v689_v1, %v687_v0  ;;  %v1112_v63 = vld [vmem:[%s2658_s7 + $0x1c8] sm:$0xff]  ;;  %v1114_v0 = vld [vmem:[%s2658_s7 + $0x1d8] sm:$0xff]  ;;  %v1111_v1 = vld [vmem:[%s2658_s7 + $0x1c0] sm:$0xff] }
 0x15f   : > { %1788 = vmatpush1.bf16.msra.mxu0 %v1787_v7  ;;  %v1829_v7 = vpack.c.bf16 %v693_v6, %v691_v5  ;;  %v1901_v6 = vpack.c.bf16 %v1118_v17, %v1116_v4 }
 0x160   : > { %1790 = vmatprep.subr.bf16.mxu0 %v1789_v8  ;;  %v690_v8 = vld [vmem:[%s2645_s19 + $0x7a0] sm:$0xff] }
 0x161   : > { %v1831_v13 = vpack.c.bf16 %v692_v9, %v690_v8 }
 0x163   : > { %1792 = vmatpush1.bf16.msra.mxu0 %v1791_v14  ;;  %v1833_v14 = vpack.c.bf16 %v697_v12, %v695_v10  ;;  %v706_v12 = vsub.s32 0, %v2691_v36 }
 0x164   : > { %1794 = vmatprep.subr.bf16.mxu0 %v1793_v15  ;;  %v694_v15 = vld [vmem:[%s2645_s19 + $0x7c0] sm:$0xff] }
 0x165   : > { %v1835_v21 = vpack.c.bf16 %v696_v16, %v694_v15 }
 0x167   : > { %1796 = vmatpush1.bf16.msra.mxu0 %v1795_v22  ;;  %v1837_v22 = vpack.c.bf16 %v701_v20, %v699_v18 }
 0x168   : > { %1798 = vmatprep.subr.bf16.mxu0 %v1797_v23  ;;  %v698_v23 = vld [vmem:[%s2645_s19 + $0x7e0] sm:$0xff] }
 0x169   : > { %v1839_v25 = vpack.c.bf16 %v700_v24, %v698_v23 }
 0x16b   : > { %1800 = vmatpush1.bf16.msra.mxu0 %v1799_v27  ;;  %v1873_v27 = vpack.c.bf16 %v1090_v26, %v1088_v48 }
 0x16c   : > { %1802 = vmatprep.subr.bf16.mxu0 %v1801_v28  ;;  %v1087_v28 = vld [vmem:[%s2658_s7 + $0x100] sm:$0xff] }
 0x16d   : > { %1874 = vmatprep.subr.bf16.mxu1 %v1873_v27  ;;  %v1875_v30 = vpack.c.bf16 %v1089_v29, %v1087_v28 }
 0x16f   : > { %1804 = vmatpush1.bf16.msra.mxu0 %v1803_v33  ;;  %1876 = vmatpush1.bf16.msra.mxu1 %v1875_v30  ;;  %v1877_v33 = vpack.c.bf16 %v1094_v32, %v1092_v31 }
 0x170   : > { %1806 = vmatprep.subr.bf16.mxu0 %v1805_v11  ;;  %v1091_v11 = vld [vmem:[%s2658_s7 + $0x120] sm:$0xff] }
 0x171   : > { %1878 = vmatprep.subr.bf16.mxu1 %v1877_v33 }
 0x173   : > { %1808 = vmatpush1.bf16.msra.mxu0 %v1807_v40  ;;  %v1095_v40 = vld [vmem:[%s2658_s7 + $0x140] sm:$0xff] }
 0x174   : > { %1810 = vmatprep.subr.bf16.mxu0 %v1809_v41  ;;  %v1097_v41 = vld [vmem:[%s2658_s7 + $0x150] sm:$0xff] }
 0x175   : > { %v1883_v42 = vpack.c.bf16 %v1097_v41, %v1095_v40  ;;  %v1234_v40 = vld [vmem:[#allocation11] sm:$0xff] (!%p1539_p0) }
 0x177   : > { %1812 = vmatpush1.bf16.msra.mxu0 %v1811_v47  ;;  %v1099_v47 = vld [vmem:[%s2658_s7 + $0x160] sm:$0xff] }
 0x178   : > { %1814 = vmatprep.subr.bf16.mxu0 %v1813_v49  ;;  %v1101_v49 = vld [vmem:[%s2658_s7 + $0x170] sm:$0xff] }
 0x179   : > { %v1887_v50 = vpack.c.bf16 %v1101_v49, %v1099_v47  ;;  %v1909_v47 = vpack.c.bf16 (!%p1539_p0), %v1253_v45, %v1252_v43  ;;  %v1236_v49 = vld [vmem:[#allocation11 + $0x10] sm:$0xff] (!%p1539_p0) }
 0x17b   : > { %1816 = vmatpush1.bf16.msra.mxu0 %v1815_v53  ;;  %v1103_v53 = vld [vmem:[%s2658_s7 + $0x180] sm:$0xff] }
 0x17c   : > { %1818 = vmatprep.subr.bf16.mxu0 %v1817_v55  ;;  %v1105_v55 = vld [vmem:[%s2658_s7 + $0x190] sm:$0xff] }
 0x17d   : > { %v1891_v56 = vpack.c.bf16 %v1105_v55, %v1103_v53  ;;  %v1913_v53 = vpack.c.bf16 (!%p1539_p0), %v1255_v52, %v1254_v51  ;;  %v1238_v55 = vld [vmem:[#allocation11 + $0x20] sm:$0xff] (!%p1539_p0) }
 0x17f   : > { %1820 = vmatpush1.bf16.msra.mxu0 %v1819_v60  ;;  %v1107_v60 = vld [vmem:[%s2658_s7 + $0x1a0] sm:$0xff] }
 0x180   : > { %1822 = vmatprep.subr.bf16.mxu0 %v1821_v61  ;;  %v1109_v61 = vld [vmem:[%s2658_s7 + $0x1b0] sm:$0xff] }
 0x181   : > { %v1895_v62 = vpack.c.bf16 %v1109_v61, %v1107_v60  ;;  %v1917_v60 = vpack.c.bf16 (!%p1539_p0), %v1257_v58, %v1256_v57  ;;  %v1240_v61 = vld [vmem:[#allocation11 + $0x30] sm:$0xff] (!%p1539_p0) }
 0x183   : > { %1824 = vmatpush1.bf16.msra.mxu0 %v1823_v2  ;;  %v1897_v2 = vpack.c.bf16 %v1114_v0, %v1112_v63  ;;  %v1258_v63 = vld [vmem:[#allocation11 + $0xc0] sm:$0xff] (!%p1539_p0)  ;;  %v1259_v0 = vld [vmem:[#allocation11 + $0xc8] sm:$0xff] (!%p1539_p0) }
 0x184   : > { %1826 = vmatprep.subr.bf16.mxu0 %v1825_v3  ;;  %v1113_v3 = vld [vmem:[%s2658_s7 + $0x1d0] sm:$0xff]  ;;  %v1921_v17 = vpack.c.bf16 (!%p1539_p0), %v1259_v0, %v1258_v63 }
 0x185   : > { %v1899_v5 = vpack.c.bf16 %v1113_v3, %v1111_v1  ;;  %v1208_v1 = vld [vmem:[#allocation9] sm:$0x3] (!%p1539_p0) }
 0x186   : > { %v1213_v3 = vrot.slane (!%p1539_p0), %v1208_v1, %v706_v12 }
 0x187   : > { %1828 = vmatpush1.bf16.msra.mxu0 %v1827_v19  ;;  %v1115_v19 = vld [vmem:[%s2658_s7 + $0x1e0] sm:$0xff] }
 0x188   : > { %1830 = vmatprep.subr.bf16.mxu0 %v1829_v7  ;;  %v1117_v7 = vld [vmem:[%s2658_s7 + $0x1f0] sm:$0xff] }
 0x189   : > { %v1903_v8 = vpack.c.bf16 %v1117_v7, %v1115_v19  ;;  %v1260_v19 = vld [vmem:[#allocation11 + $0xd0] sm:$0xff] (!%p1539_p0)  ;;  %v1261_v7 = vld [vmem:[#allocation11 + $0xd8] sm:$0xff] (!%p1539_p0) }
 0x18b   : > { %1832 = vmatpush1.bf16.msra.mxu0 %v1831_v13  ;;  %v702_v13 = vld [vmem:[%s2652_s0] sm:$0x3] }
 0x18c   : > { %1834 = vmatprep.subr.bf16.mxu0 %v1833_v14  ;;  %v710_v14 = vsub.s32 1, %v2691_v36  ;;  %v707_v15 = vrot.slane %v702_v13, %v706_v12  ;;  %v1262_v12 = vld [vmem:[#allocation11 + $0xe0] sm:$0xff] (!%p1539_p0) }
 0x18e   : > { %v711_v16 = vrot.slane %v702_v13, %v710_v14  ;;  %v1217_v4 = vrot.slane (!%p1539_p0), %v1208_v1, %v710_v14 }
 0x18f   : > { %1836 = vmatpush1.bf16.msra.mxu0 %v1835_v21 }
 0x190   : > { %1838 = vmatprep.subr.bf16.mxu0 %v1837_v22 }
 0x193   : > { %1840 = vmatpush1.bf16.msra.mxu0 %v1839_v25 }
 0x196   : > { %1036 = vmatmul.mubr.f32.vlgmr.msra.gmra.mrb[0].mxu0 %v2924_v35  ;;  %v1093_v35 = vld [vmem:[%s2658_s7 + $0x130] sm:$0xff] }
 0x197   : > { %v1879_v34 = vpack.c.bf16 %v1093_v35, %v1091_v11  ;;  %v1054_v35 = vld [vmem:[#allocation2] sm:$0xf] }
 0x199   : > { %1880 = vmatpush1.bf16.msra.mxu1 %v1879_v34 }
 0x19a   : > { %1882 = vmatprep.subr.bf16.mxu1 %v1881_v39  ;;  %v1251_v39 = vld [vmem:[#allocation11 + $0x88] sm:$0xff] (!%p1539_p0) }
 0x19b   : > { %v1905_v41 = vpack.c.bf16 (!%p1539_p0), %v1251_v39, %v1250_v38 }
 0x19d   : > { %1884 = vmatpush1.bf16.msra.mxu1 %v1883_v42  ;;  %v1235_v42 = vld [vmem:[#allocation11 + $0x8] sm:$0xff] (!%p1539_p0)  ;;  %1906 = vmatprep.subr.bf16.mxu0 (!%p1539_p0), %v1905_v41 }
 0x19e   : > { %1886 = vmatprep.subr.bf16.mxu1 %v1885_v46  ;;  %v1907_v46 = vpack.c.bf16 (!%p1539_p0), %v1235_v42, %v1234_v40 }
 0x1a0   : > { %1908 = vmatpush3.bf16.msra.mxu0 (!%p1539_p0), %v1907_v46 }
 0x1a1   : > { %1888 = vmatpush1.bf16.msra.mxu1 %v1887_v50  ;;  %v1237_v50 = vld [vmem:[#allocation11 + $0x18] sm:$0xff] (!%p1539_p0)  ;;  %1910 = vmatprep.subr.bf16.mxu0 (!%p1539_p0), %v1909_v47 }
 0x1a2   : > { %1890 = vmatprep.subr.bf16.mxu1 %v1889_v54  ;;  %v1911_v54 = vpack.c.bf16 (!%p1539_p0), %v1237_v50, %v1236_v49 }
 0x1a4   : > { %1912 = vmatpush3.bf16.msra.mxu0 (!%p1539_p0), %v1911_v54 }
 0x1a5   : > { %1892 = vmatpush1.bf16.msra.mxu1 %v1891_v56  ;;  %v1239_v56 = vld [vmem:[#allocation11 + $0x28] sm:$0xff] (!%p1539_p0)  ;;  %1914 = vmatprep.subr.bf16.mxu0 (!%p1539_p0), %v1913_v53 }
 0x1a6   : > { %1894 = vmatprep.subr.bf16.mxu1 %v1893_v59  ;;  %v1915_v59 = vpack.c.bf16 (!%p1539_p0), %v1239_v56, %v1238_v55 }
 0x1a8   : > { %1916 = vmatpush3.bf16.msra.mxu0 (!%p1539_p0), %v1915_v59 }
 0x1a9   : > { %1896 = vmatpush1.bf16.msra.mxu1 %v1895_v62  ;;  %v1241_v62 = vld [vmem:[#allocation11 + $0x38] sm:$0xff] (!%p1539_p0)  ;;  %1918 = vmatprep.subr.bf16.mxu0 (!%p1539_p0), %v1917_v60 }
 0x1aa   : > { %1898 = vmatprep.subr.bf16.mxu1 %v1897_v2  ;;  %v1919_v2 = vpack.c.bf16 (!%p1539_p0), %v1241_v62, %v1240_v61 }
 0x1ac   : > { %1920 = vmatpush3.bf16.msra.mxu0 (!%p1539_p0), %v1919_v2 }
 0x1ad   : > { %1900 = vmatpush1.bf16.msra.mxu1 %v1899_v5  ;;  %v1242_v5 = vld [vmem:[#allocation11 + $0x40] sm:$0xff] (!%p1539_p0)  ;;  %1922 = vmatprep.subr.bf16.mxu0 (!%p1539_p0), %v1921_v17 }
 0x1ae   : > { %1902 = vmatprep.subr.bf16.mxu1 %v1901_v6  ;;  %v1243_v6 = vld [vmem:[#allocation11 + $0x48] sm:$0xff] (!%p1539_p0) }
 0x1b1   : > { %1904 = vmatpush1.bf16.msra.mxu1 %v1903_v8  ;;  %v1218_v8 = vcombine.low (!%p1539_p0), %v1213_v3, %v1217_v4 }
 0x1b3   : > { %v1225_v13 = vrot.slane (!%p1539_p0), %v1218_v8, %v2698_v44 }
 0x20c   : > { %v824_v9 = vpop.f32.mrb[0].mxu1 }
 0x20d   : > { %v826_v10 = vpop.f32.mrb[1].mxu1  ;;  %v825_v18 = vadd.f32 %v824_v9, %v707_v15  ;;  %v1925_v15 = vpack.c.bf16 (!%p1539_p0), %v1261_v7, %v1260_v19 }
 0x20e   : > { %v827_v20 = vadd.f32 %v826_v10, %v711_v16  ;;  %v1923_v10 = vpack.c.bf16 (!%p1539_p0), %v1243_v6, %v1242_v5  ;;  %v1244_v16 = vld [vmem:[#allocation11 + $0x50] sm:$0xff] (!%p1539_p0) }
 0x210   : > { %1924 = vmatpush3.bf16.msra.mxu0 (!%p1539_p0), %v1923_v10 }
 0x211   : > { %1926 = vmatprep.subr.bf16.mxu0 (!%p1539_p0), %v1925_v15 }
 0x269   : > { %v1037_v21 = vpop.f32.mrb[0].mxu0 }
 0x26a   : > { %v1938_v22 = vadd.f32 %v1037_v21, %v825_v18  ;;  %v1039_v23 = vpop.f32.mrb[1].mxu0  ;;  %v1245_v18 = vld [vmem:[#allocation11 + $0x58] sm:$0xff] (!%p1539_p0) }
 0x26b   : > { %v1940_v24 = vadd.f32 %v1039_v23, %v827_v20  ;;  %v1263_v20 = vld [vmem:[#allocation11 + $0xe8] sm:$0xff] (!%p1539_p0)  ;;  %v1927_v14 = vpack.c.bf16 (!%p1539_p0), %v1245_v18, %v1244_v16  ;;  %v1246_v23 = vld [vmem:[#allocation11 + $0x60] sm:$0xff] (!%p1539_p0) }
 0x26c   : > { %v1537_v25 = vmul.f32 -1.442695, %v1938_v22  ;;  %v1929_v22 = vpack.c.bf16 (!%p1539_p0), %v1263_v20, %v1262_v12 }
 0x26d   : > { %v1538_v48 = vmul.f32 -1.442695, %v1940_v24  ;;  %v1247_v24 = vld [vmem:[#allocation11 + $0x68] sm:$0xff] (!%p1539_p0)  ;;  %1928 = vmatpush3.bf16.msra.mxu0 (!%p1539_p0), %v1927_v14 }
 0x26e   : > { %2056 = vpow2.f32 %v1537_v25  ;;  %v1264_v25 = vld [vmem:[#allocation11 + $0xf0] sm:$0xff] (!%p1539_p0)  ;;  %1930 = vmatprep.subr.bf16.mxu0 (!%p1539_p0), %v1929_v22 }
 0x26f   : > { %2058 = vpow2.f32 %v1538_v48  ;;  %v1265_v48 = vld [vmem:[#allocation11 + $0xf8] sm:$0xff] (!%p1539_p0) }
 0x278   : > { %v2057_v26 = vpop.eup %2056 }
 0x279   : > { %v2059_v27 = vpop.eup %2058  ;;  %v1048_v28 = vadd.f32 1.0, %v2057_v26  ;;  %v1931_v26 = vpack.c.bf16 (!%p1539_p0), %v1247_v24, %v1246_v23 }
 0x27a   : > { %v1049_v29 = vadd.f32 1.0, %v2059_v27  ;;  %v1933_v27 = vpack.c.bf16 (!%p1539_p0), %v1265_v48, %v1264_v25 }
 0x27b   : > { %1932 = vmatpush3.bf16.msra.mxu0 (!%p1539_p0), %v1931_v26 }
 0x27c   : > { %2060 = vrcp.f32 %v1049_v29  ;;  %v1249_v29 = vld [vmem:[#allocation11 + $0x78] sm:$0xff] (!%p1539_p0)  ;;  %1934 = vmatprep.subr.bf16.mxu0 (!%p1539_p0), %v1933_v27 }
 0x27d   : > { %2062 = vrcp.f32 %v1048_v28  ;;  %v1248_v28 = vld [vmem:[#allocation11 + $0x70] sm:$0xff] (!%p1539_p0) }
 0x286   : > { %v2061_v30 = vpop.eup %2060 }
 0x287   : > { %v2063_v31 = vpop.eup %2062  ;;  %1183 = vmatprep.mubr.f32.mxu1 %v2061_v30  ;;  %v1935_v30 = vpack.c.bf16 (!%p1539_p0), %v1249_v29, %v1248_v28 }
 0x288   : > { %1184 = vmatmul.mubr.f32.vlgmr.msra.gmra.mrb[2].mxu1 %v2063_v31 }
 0x289   : > { %1936 = vmatpush3.bf16.msra.mxu0 (!%p1539_p0), %v1935_v30 }
 0x35b   : > { %v1185_v32 = vpop.f32.mrb[2].mxu1 }
 0x35c   : > { %v1187_v33 = vpop.f32.mrb[3].mxu1 }
 0x35d   : > { %v1192_v11 = vcombine.low %v1185_v32, %v1187_v33  ;;  %1206 = sbr.rel (%p1539_p0) target bundleno = 1126 (0x466), region = 80 }
 0x35f   : > { %v1199_v34 = vrot.slane %v1192_v11, %v2698_v44 }
 0x361   : > { %v1201_v37 = vadd.f32 %v1199_v34, %v1054_v35 }
 0x363   : > { %1202 = vst [vmem:[#allocation2] sm:$0xf] %v1201_v37  ;;  %v1541_v37 = vld [vmem:[#allocation12] ss:$0 sm:$0xff] (!%p1539_p0) }
 0x36a   : > { %v1207_v9 = vld [vmem:[#allocation2] sm:$0xf] }
 0x36b   : > { %v1227_v36 = vadd.f32 %v1225_v13, %v1207_v9 }
 0x36d   : > { %v1540_v21 = vmul.f32 -1.442695, %v1227_v36 }
 0x36f   : > { %2064 = vpow2.f32 %v1540_v21 }
 0x379   : > { %v2065_v31 = vpop.eup %2064 }
 0x37a   : > { %v1231_v32 = vadd.f32 1.0, %v2065_v31 }
 0x37c   : > { %2066 = vrcp.f32 %v1231_v32 }
 0x386   : > { %v2067_v33 = vpop.eup %2066 }
 0x387   : > { %v1280_v11 = vrot.slane %v2067_v33, %v2698_v44 }
 0x389   : > { %v1281_v35 = vcombine.high %v1280_v11, %v1280_v11 }
 0x38b   : > { %1348 = vmatprep.mubr.f32.mxu0 %v1281_v35 }
 0x38c   : > { %1349 = vmatmul.mubr.f32.vlgmr.msra.gmra.mrb[0].mxu0 %v1280_v11 }
 0x45f   : > { %v1582_v34 = vpop.f32.mrb[0].mxu0 }
 0x460   : > { %v1583_v38 = vpop.f32.mrb[1].mxu0 }
 0x461   : > { %v1584_v39 = vadd.f32 %v1583_v38, %v1582_v34 }
 0x463   : > { %v1351_v40 = vadd.f32 %v1584_v39, %v1541_v37 }
 0x465   : > { %1354 = vst [vmem:[#allocation14] sm:$0x3] %v1351_v40 }
 0x466 PF: > { %p1994_p12 = scmp.eq.s32.totalorder %s2418_s30, 1  ;;  %s2348_s27 = smov [#allocation14]  }
 0x467   : > { %s1364_s18 = sshll.u32 %s2348_s27, 4  ;;  %s1365_s18 = int_to_ptr.vmem [resolvable:$true] %s1364_s18 }
 0x468   : > { %s2242_s13 = scalar_lea.vmem %s1365_s18, 32  ;;  %p2249_p9 = scmp.lt.s32.totalorder %s1365_s18, %s1365_s18 }
 0x469   : > { %p2243_p3 = scmp.ne.s32.totalorder %s1365_s18, %s2242_s13  ;;  %p2250_p11 = scmp.lt.s32.totalorder %s2242_s13, %s2242_s13 }
 0x46b   : > { %p2244_p4 = pnand %p2243_p3, %p1994_p12  ;;  %p2251_p10 = por %p2250_p11, %p2249_p9 }
 0x46d   : > { %p2245_p5 = pneg %p2244_p4 }
 0x46f   : > { %p2252_p8 = pnand %p2251_p10, %p2245_p5 }
 0x471   : > { %2255 = shalt.err (!%p2252_p8)
}
 0x472   : > { %s3144_s2 = sld [smem:[#allocation27_spill]] }
 0x478   : > { %s2256_s26 = scalar_lea.hbm %s3144_s2, 32 }
 0x479   : > { %p2257_p7 = scmp.ne.s32.totalorder %s3144_s2, %s2256_s26  ;;  %p2262_p6 = scmp.lt.u32.totalorder %s2256_s26, %s3144_s2 }
 0x47b   : > { %p2258_p13 = pnand %p2257_p7, %p1994_p12 }
 0x47d   : > { %p2259_p2 = pneg %p2258_p13 }
 0x47f   : > { %p2264_p1 = pnand %p2262_p6, %p2259_p2 }
 0x481   : > { %2267 = shalt.err (!%p2264_p1)
}
 0x482   : > { %1964 = dma.vmem_to_hbm [thread:$0]  (%p1994_p12), %s1365_s18, 32, %s3144_s2, [#allocation5]  }
 0x483   : > { %2309 = dma.done.wait (%p1994_p12), [#allocation5], 32  }
 0x484   : > { %2311 = vsyncadd (%p1994_p12), [#allocation5], 4294967264 }
 0x485 PF: > { %s3145_s11 = sld [smem:[#allocation21_spill]]  ;;  %s3146_s4 = sld [smem:[#allocation20_spill]] }
 0x486   : > { %s3147_s26 = sld [smem:[#allocation23_spill]]  ;;  %s3148_s0 = sld [smem:[#allocation22_spill]] }
 0x487   : > { %s3149_s24 = smov %s2318_s25  ;;  %s3151_s27 = smov %s2330_s28 }
 0x48b   : > { %s26_s29 = sadd.s32 1, %s3145_s11   ;;  %s3150_s25 = smov %s3146_s4 }
 0x48c   : > { %p23_p0 = scmp.ge.s32.totalorder %s26_s29, 4   ;;  %s3152_s28 = smov %s3148_s0 }
 0x48e   :  { %25 = sbr.rel (!%p23_p0) target bundleno = 14 (0xe), region = 133 }
 0x495   :  { %1377 = vsyncpa [#allocation4], 1 }
 0x496   :  { %1379 = vsyncpa [#allocation4 + $0x1], 1 }
 0x497   :  { %1380 = vsyncpa [#allocation7], 1 }
 0x498   :  { %1382 = vsyncpa [#allocation7 + $0x1], 1 }
 0x499   :  { %1383 = vsyncpa [#allocation10], 1 }
 0x49a   :  { %1384 = vsyncpa [#allocation13], 1 }
 0x49b   :  { %1385 = vsyncpa [#allocation5], 1 }
 0x49c   :  { %1387 = vsyncpa [#allocation5 + $0x1], 1 }

</bundles_post_ra>
